<compile_context>
chip_gen: v7x
topology: tpu7x:2x2x1
jax: 0.10.0
libtpu: 0.0.40
codegen_flags: <defaults>
</compile_context>

<pallas_src>
import functools
import numpy as np
import jax
import jax.numpy as jnp
from jax.experimental import pallas as pl
from jax.experimental.pallas import tpu as pltpu


# ----------------------------------------------------------------------------
# Fused C2f kernel (one grid step == `nb` images, lane-dense (C, L) layout)
# ----------------------------------------------------------------------------
def _c2f_fused_kernel(c, c2, n_b, W, add_flags, mxu_dtype, approx_silu,
                      x_ref, mask_ref, wcv1_ref, bcv1_ref,
                      wm_ref, bm_ref, wcv2_ref, bcv2_ref, o_ref):
    L = x_ref.shape[-1]                                   # nb * H * W (lanes)

    def silu(z):
        if approx_silu:
            # exp + reciprocal both land on the EUP slot -> VALU stays free.
            return z * pl.reciprocal(1.0 + jnp.exp(-z), approx=True)
        return z * jax.nn.sigmoid(z)

    def mxu(w, a):
        return jnp.dot(w.astype(mxu_dtype), a.astype(mxu_dtype),
                       preferred_element_type=jnp.float32)

    x = x_ref[...]                                        # (C1, L)
    # cv1: 1x1 conv (BN scale folded into weights) + bias + SiLU.
    y = silu(mxu(wcv1_ref[...], x) + bcv1_ref[...])       # (2c, L) f32
    ys = [y[:c], y[c:]]                                   # chunk(2, channel)

    mask = mask_ref[...]                                  # (9, 1, L) f32 const

    def conv3x3(t, w, b):
        # t: (c, L) f32; w: (c, 9c) mxu_dtype; b: (c, 1) f32.
        # 9 XLU lane rotations give the taps; one broadcast multiply applies
        # the zero-pad border mask (also kills cross-image wrap-around when
        # multiple images share the lane axis); ONE K=9c MXU dot does the conv.
        taps = []
        for k in range(9):
            dy, dx = k // 3 - 1, k % 3 - 1
            shift = (-(dy * W + dx)) % L
            taps.append(pltpu.roll(t, shift, 1) if shift else t)
        taps = jnp.stack(taps, axis=0)                    # (9, c, L)
        taps = (taps * mask).reshape(9 * c, L)            # (9c, L) f32
        return silu(mxu(w, taps) + b)

    for i in range(n_b):
        prev = ys[-1]
        t = conv3x3(prev, wm_ref[2 * i], bm_ref[2 * i])
        t = conv3x3(t, wm_ref[2 * i + 1], bm_ref[2 * i + 1])
        if add_flags[i]:
            t = prev + t                                  # residual in f32
        ys.append(t)

    # cv2: materialize the tiny concat and do ONE K=(2+n)c dot.
    cat = jnp.concatenate(ys, axis=0)                     # ((2+n)c, L)
    o_ref[...] = silu(mxu(wcv2_ref[...], cat) + bcv2_ref[...]).astype(o_ref.dtype)


# ----------------------------------------------------------------------------
# Wrapper: weight folding / layout prep / pallas_call setup
# ----------------------------------------------------------------------------
def _pick_images_per_step(N, HW):
    # Batch images along the lane axis to amortize per-grid-step overhead while
    # keeping >= 2 grid steps when possible (feeds both v7x TensorCores).
    target_steps = 2 if N >= 2 else 1
    nb = max(1, N // target_steps)
    while N % nb:
        nb -= 1
    if (nb * HW) % 128 != 0:      # keep the lane block a multiple of 128
        nb = N
    return nb


def c2f_forward(x_nchw, params, *, mxu_dtype=jnp.bfloat16, approx_silu=True,
                images_per_step=None):
    N, C1, H, W = x_nchw.shape
    HW = H * W
    c = params["c"]
    n_b = len(params["m"])
    assert n_b >= 1
    c2 = params["cv2"]["w4"].shape[-1]

    nb = images_per_step or _pick_images_per_step(N, HW)
    assert N % nb == 0
    L = nb * HW

    # NCHW -> channel-major flat spatial (C1, N*HW): one XLA transpose outside
    # the kernel; inside, every feature map is a lane-dense (C, L) slab.
    xf = x_nchw.reshape(N, C1, HW).transpose(1, 0, 2).reshape(C1, N * HW)
    xf = xf.astype(mxu_dtype)     # activations only feed cv1's MXU dot

    def fold_1x1(p):
        w = p["w4"][0, 0]                                 # (Cin, Cout)
        s = p["scale"].reshape(-1)
        b = p["bias"].reshape(-1, 1)
        return (w * s[None, :]).T.astype(mxu_dtype), b    # (Cout, Cin), (Cout,1)

    def fold_3x3(p):
        cin, cout = p["w4"].shape[2], p["w4"].shape[3]
        w = p["w4"] * p["scale"].reshape(1, 1, 1, -1)     # (3,3,Cin,Cout), BN folded
        w = jnp.transpose(w, (3, 0, 1, 2)).reshape(cout, 9 * cin)   # (Cout, 9*Cin)
        return w.astype(mxu_dtype), p["bias"].reshape(-1, 1)

    wcv1, bcv1 = fold_1x1(params["cv1"])                  # (2c, C1), (2c, 1)
    wcv2, bcv2 = fold_1x1(params["cv2"])                  # (c2, (2+n)c), (c2, 1)

    wm_l, bm_l, add_flags = [], [], []
    for bp in params["m"]:
        w1, b1 = fold_3x3(bp["cv1"])
        w2, b2 = fold_3x3(bp["cv2"])
        wm_l += [w1, w2]
        bm_l += [b1, b2]
        add_flags.append(bool(bp["add"]))
    wm = jnp.stack(wm_l)                                  # (2*n_b, c, 9c)
    bm = jnp.stack(bm_l)                                  # (2*n_b, c, 1)

    # Zero-pad border masks for the 9 taps: host-built, tiled over nb images.
    yy, xx = np.divmod(np.arange(HW), W)
    m9 = np.ones((9, HW), np.float32)
    for k in range(9):
        dy, dx = k // 3 - 1, k % 3 - 1
        valid = np.ones(HW, bool)
        if dx == -1:
            valid &= xx >= 1
        elif dx == 1:
            valid &= xx <= W - 2
        if dy == -1:
            valid &= yy >= 1
        elif dy == 1:
            valid &= yy <= H - 2
        m9[k] = valid.astype(np.float32)
    mask = jnp.asarray(np.tile(m9, (1, nb)).reshape(9, 1, L))

    operands = [xf, mask, wcv1, bcv1, wm, bm, wcv2, bcv2]

    def const_spec(a):
        nd = a.ndim
        return pl.BlockSpec(a.shape, lambda g, _nd=nd: (0,) * _nd)

    in_specs = [pl.BlockSpec((C1, L), lambda g: (0, g))]
    in_specs += [const_spec(a) for a in operands[1:]]

    kern = functools.partial(_c2f_fused_kernel, c, c2, n_b, W,
                             tuple(add_flags), mxu_dtype, approx_silu)
    out = pl.pallas_call(
        kern,
        out_shape=jax.ShapeDtypeStruct((c2, N * HW), x_nchw.dtype),
        grid=(N // nb,),
        in_specs=in_specs,
        out_specs=pl.BlockSpec((c2, L), lambda g: (0, g)),
        compiler_params=pltpu.CompilerParams(
            dimension_semantics=("parallel",)),
    )(*operands)
    return out.reshape(c2, N, HW).transpose(1, 0, 2).reshape(N, c2, H, W)


# ----------------------------------------------------------------------------
# Pure-JAX reference (for correctness check)
# ----------------------------------------------------------------------------
def _conv_bn_silu_ref(x, p, pad):
    y = jax.lax.conv_general_dilated(
        x, p["w4"], window_strides=(1, 1), padding=pad,
        dimension_numbers=("NHWC", "HWIO", "NHWC"))
    z = y * p["scale"].reshape(1, 1, 1, -1) + p["bias"].reshape(1, 1, 1, -1)
    return z * jax.nn.sigmoid(z)


def c2f_forward_ref(x_nchw, params):
    x = jnp.transpose(x_nchw, (0, 2, 3, 1))
    c = params["c"]
    y = _conv_bn_silu_ref(x, params["cv1"], [(0, 0), (0, 0)])
    ys = [y[..., :c], y[..., c:]]
    for bp in params["m"]:
        prev = ys[-1]
        t = _conv_bn_silu_ref(prev, bp["cv1"], [(1, 1), (1, 1)])
        t = _conv_bn_silu_ref(t, bp["cv2"], [(1, 1), (1, 1)])
        if bp["add"]:
            t = prev + t
        ys.append(t)
    out = _conv_bn_silu_ref(jnp.concatenate(ys, axis=-1),
                            params["cv2"], [(0, 0), (0, 0)])
    return jnp.transpose(out, (0, 3, 1, 2))


# ----------------------------------------------------------------------------
# Deterministic parameter construction (mirrors C2f.__init__ shapes)
# ----------------------------------------------------------------------------
def make_conv_params(key, cin, cout, k):
    kw, kg, kb, km, kv = jax.random.split(key, 5)
    w = jax.random.normal(kw, (k, k, cin, cout), jnp.float32) / np.sqrt(cin * k * k)
    gamma = 1.0 + 0.1 * jax.random.normal(kg, (cout,), jnp.float32)
    beta = 0.1 * jax.random.normal(kb, (cout,), jnp.float32)
    mean = 0.05 * jax.random.normal(km, (cout,), jnp.float32)
    var = 1.0 + 0.1 * jax.random.uniform(kv, (cout,), jnp.float32)
    eps = 1e-5  # nn.BatchNorm2d default
    scale = gamma / jnp.sqrt(var + eps)
    bias = beta - mean * scale
    return {"w4": w, "scale": scale.reshape(1, cout), "bias": bias.reshape(1, cout)}


def make_c2f_params(key, c1, c2, n=1, shortcut=False, e=0.5):
    c = int(c2 * e)
    keys = jax.random.split(key, 2 + 2 * n)
    params = {
        "c": c,
        "cv1": make_conv_params(keys[0], c1, 2 * c, 1),
        "cv2": make_conv_params(keys[1], (2 + n) * c, c2, 1),
        "m": [],
    }
    for i in range(n):
        # Bottleneck(c, c, shortcut, g=1, k=((3,3),(3,3)), e=1.0)
        params["m"].append({
            "cv1": make_conv_params(keys[2 + 2 * i], c, c, 3),
            "cv2": make_conv_params(keys[3 + 2 * i], c, c, 3),
            "add": bool(shortcut),  # c1 == c2 inside the bottleneck
        })
    return params


# ----------------------------------------------------------------------------
if __name__ == "__main__":
    c1, c2, n = 16, 16, 2
    N, H, W = 4, 16, 16

    key = jax.random.PRNGKey(0)
    kx, kp = jax.random.split(key)
    x = jax.random.normal(kx, (N, c1, H, W), jnp.float32)   # NCHW like PyTorch
    params = make_c2f_params(kp, c1, c2, n=n, shortcut=True, e=0.5)

    ref = jax.block_until_ready(c2f_forward_ref(x, params))

    # 1) Accuracy mode: f32 MXU operands + exact sigmoid -> tight parity check.
    out_f32 = jax.jit(lambda a: c2f_forward(a, params, mxu_dtype=jnp.float32,
                                            approx_silu=False))(x)
    out_f32 = jax.block_until_ready(out_f32)
    np.testing.assert_allclose(np.asarray(out_f32), np.asarray(ref),
                               rtol=5e-3, atol=5e-3)

    # 2) Perf mode (default): bf16 MXU operands + EUP-approx SiLU.
    out = jax.jit(lambda a: c2f_forward(a, params))(x)
    out = jax.block_until_ready(out)
    np.testing.assert_allclose(np.asarray(out), np.asarray(ref),
                               rtol=5e-2, atol=5e-2)

    assert out.shape == (N, c2, H, W)
    print("KERNEL_OK")
</pallas_src>

<mosaic_0001>
module attributes {stable_mosaic.version = 11 : i64} {
  func.func @_c2f_fused_kernel(%arg0: i32, %arg1: memref<16x512xf32, #tpu.memory_space<vmem>>, %arg2: memref<9x1x512xf32, #tpu.memory_space<vmem>>, %arg3: memref<16x16xf32, #tpu.memory_space<vmem>>, %arg4: memref<16x1xf32, #tpu.memory_space<vmem>>, %arg5: memref<4x8x72xf32, #tpu.memory_space<vmem>>, %arg6: memref<4x8x1xf32, #tpu.memory_space<vmem>>, %arg7: memref<16x32xf32, #tpu.memory_space<vmem>>, %arg8: memref<16x1xf32, #tpu.memory_space<vmem>>, %arg9: memref<16x512xf32, #tpu.memory_space<vmem>>) attributes {dimension_semantics = [#tpu.dimension_semantics<parallel>], iteration_bounds = array<i64: 2>, scalar_prefetch = 0 : i64, scratch_operands = 0 : i64, tpu.core_type = #tpu.core_type<tc>, window_params = [{transform_indices = @transform_0, window_bounds = array<i64: 16, 512>}, {pipeline_mode = #tpu.pipeline_mode<synchronous>, transform_indices = @transform_1, window_bounds = array<i64: 9, 1, 512>}, {pipeline_mode = #tpu.pipeline_mode<synchronous>, transform_indices = @transform_2, window_bounds = array<i64: 16, 16>}, {pipeline_mode = #tpu.pipeline_mode<synchronous>, transform_indices = @transform_3, window_bounds = array<i64: 16, 1>}, {pipeline_mode = #tpu.pipeline_mode<synchronous>, transform_indices = @transform_4, window_bounds = array<i64: 4, 8, 72>}, {pipeline_mode = #tpu.pipeline_mode<synchronous>, transform_indices = @transform_5, window_bounds = array<i64: 4, 8, 1>}, {pipeline_mode = #tpu.pipeline_mode<synchronous>, transform_indices = @transform_6, window_bounds = array<i64: 16, 32>}, {pipeline_mode = #tpu.pipeline_mode<synchronous>, transform_indices = @transform_7, window_bounds = array<i64: 16, 1>}, {transform_indices = @transform_8, window_bounds = array<i64: 16, 512>}]} {
    %c0 = arith.constant 0 : index
    %c0_0 = arith.constant 0 : index
    %0 = vector.load %arg1[%c0, %c0_0] : memref<16x512xf32, #tpu.memory_space<vmem>>, vector<16x512xf32>
    %c0_1 = arith.constant 0 : index
    %c0_2 = arith.constant 0 : index
    %1 = vector.load %arg3[%c0_1, %c0_2] : memref<16x16xf32, #tpu.memory_space<vmem>>, vector<16x16xf32>
    %cst = arith.constant dense<0.000000e+00> : vector<16x512xf32>
    %2 = tpu.matmul %1, %0, %cst {dimension_numbers = #tpu.dot_dimension_numbers<[1], [0], [0], [1], [0, 0, 1, 1], [], []>} : vector<16x16xf32>, vector<16x512xf32>, vector<16x512xf32> -> vector<16x512xf32>
    %c0_3 = arith.constant 0 : index
    %c0_4 = arith.constant 0 : index
    %3 = vector.load %arg4[%c0_3, %c0_4] : memref<16x1xf32, #tpu.memory_space<vmem>>, vector<16x1xf32>
    %4 = vector.broadcast %3 : vector<16x1xf32> to vector<16x512xf32>
    %5 = arith.addf %2, %4 : vector<16x512xf32>
    %6 = arith.negf %5 : vector<16x512xf32>
    %7 = math.exp %6 : vector<16x512xf32>
    %cst_5 = arith.constant 1.000000e+00 : f32
    %8 = vector.broadcast %cst_5 : f32 to vector<16x512xf32>
    %9 = arith.addf %8, %7 : vector<16x512xf32>
    %10 = arith.divf %8, %9 : vector<16x512xf32>
    %11 = arith.mulf %5, %10 : vector<16x512xf32>
    %12 = vector.extract_strided_slice %11 {offsets = [0, 0], sizes = [8, 512], strides = [1, 1]} : vector<16x512xf32> to vector<8x512xf32>
    %13 = vector.extract_strided_slice %11 {offsets = [8, 0], sizes = [8, 512], strides = [1, 1]} : vector<16x512xf32> to vector<8x512xf32>
    %c0_6 = arith.constant 0 : index
    %c0_7 = arith.constant 0 : index
    %c0_8 = arith.constant 0 : index
    %14 = vector.load %arg2[%c0_6, %c0_7, %c0_8] : memref<9x1x512xf32, #tpu.memory_space<vmem>>, vector<9x1x512xf32>
    %c0_9 = arith.constant 0 : index
    %c0_10 = arith.constant 0 : index
    %c0_11 = arith.constant 0 : index
    %15 = vector.load %arg5[%c0_9, %c0_10, %c0_11] : memref<4x8x72xf32, #tpu.memory_space<vmem>>, vector<1x8x72xf32>
    %16 = vector.shape_cast %15 : vector<1x8x72xf32> to vector<8x72xf32>
    %c0_12 = arith.constant 0 : index
    %c0_13 = arith.constant 0 : index
    %c0_14 = arith.constant 0 : index
    %17 = vector.load %arg6[%c0_12, %c0_13, %c0_14] : memref<4x8x1xf32, #tpu.memory_space<vmem>>, vector<1x8x1xf32>
    %18 = vector.shape_cast %17 : vector<1x8x1xf32> to vector<8x1xf32>
    %c17_i32 = arith.constant 17 : i32
    %19 = tpu.dynamic_rotate %13 by %c17_i32 dim 1 : vector<8x512xf32>, i32 -> vector<8x512xf32>
    %c16_i32 = arith.constant 16 : i32
    %20 = tpu.dynamic_rotate %13 by %c16_i32 dim 1 : vector<8x512xf32>, i32 -> vector<8x512xf32>
    %c15_i32 = arith.constant 15 : i32
    %21 = tpu.dynamic_rotate %13 by %c15_i32 dim 1 : vector<8x512xf32>, i32 -> vector<8x512xf32>
    %c1_i32 = arith.constant 1 : i32
    %22 = tpu.dynamic_rotate %13 by %c1_i32 dim 1 : vector<8x512xf32>, i32 -> vector<8x512xf32>
    %c511_i32 = arith.constant 511 : i32
    %23 = tpu.dynamic_rotate %13 by %c511_i32 dim 1 : vector<8x512xf32>, i32 -> vector<8x512xf32>
    %c497_i32 = arith.constant 497 : i32
    %24 = tpu.dynamic_rotate %13 by %c497_i32 dim 1 : vector<8x512xf32>, i32 -> vector<8x512xf32>
    %c496_i32 = arith.constant 496 : i32
    %25 = tpu.dynamic_rotate %13 by %c496_i32 dim 1 : vector<8x512xf32>, i32 -> vector<8x512xf32>
    %c495_i32 = arith.constant 495 : i32
    %26 = tpu.dynamic_rotate %13 by %c495_i32 dim 1 : vector<8x512xf32>, i32 -> vector<8x512xf32>
    %27 = vector.shape_cast %19 : vector<8x512xf32> to vector<1x8x512xf32>
    %28 = vector.shape_cast %20 : vector<8x512xf32> to vector<1x8x512xf32>
    %29 = vector.shape_cast %21 : vector<8x512xf32> to vector<1x8x512xf32>
    %30 = vector.shape_cast %22 : vector<8x512xf32> to vector<1x8x512xf32>
    %31 = vector.shape_cast %13 : vector<8x512xf32> to vector<1x8x512xf32>
    %32 = vector.shape_cast %23 : vector<8x512xf32> to vector<1x8x512xf32>
    %33 = vector.shape_cast %24 : vector<8x512xf32> to vector<1x8x512xf32>
    %34 = vector.shape_cast %25 : vector<8x512xf32> to vector<1x8x512xf32>
    %35 = vector.shape_cast %26 : vector<8x512xf32> to vector<1x8x512xf32>
    %36 = tpu.concatenate %27, %28, %29, %30, %31, %32, %33, %34, %35 in 0 : vector<1x8x512xf32>, vector<1x8x512xf32>, vector<1x8x512xf32>, vector<1x8x512xf32>, vector<1x8x512xf32>, vector<1x8x512xf32>, vector<1x8x512xf32>, vector<1x8x512xf32>, vector<1x8x512xf32> -> vector<9x8x512xf32>
    %37 = vector.broadcast %14 : vector<9x1x512xf32> to vector<9x8x512xf32>
    %38 = arith.mulf %36, %37 : vector<9x8x512xf32>
    %39 = vector.shape_cast %38 : vector<9x8x512xf32> to vector<72x512xf32>
    %cst_15 = arith.constant dense<0.000000e+00> : vector<8x512xf32>
    %40 = tpu.matmul %16, %39, %cst_15 {dimension_numbers = #tpu.dot_dimension_numbers<[1], [0], [0], [1], [0, 0, 1, 1], [], []>} : vector<8x72xf32>, vector<72x512xf32>, vector<8x512xf32> -> vector<8x512xf32>
    %41 = vector.broadcast %18 : vector<8x1xf32> to vector<8x512xf32>
    %42 = arith.addf %40, %41 : vector<8x512xf32>
    %43 = arith.negf %42 : vector<8x512xf32>
    %44 = math.exp %43 : vector<8x512xf32>
    %cst_16 = arith.constant 1.000000e+00 : f32
    %45 = vector.broadcast %cst_16 : f32 to vector<8x512xf32>
    %46 = arith.addf %45, %44 : vector<8x512xf32>
    %47 = arith.divf %45, %46 : vector<8x512xf32>
    %48 = arith.mulf %42, %47 : vector<8x512xf32>
    %c1 = arith.constant 1 : index
    %c0_17 = arith.constant 0 : index
    %c0_18 = arith.constant 0 : index
    %49 = vector.load %arg5[%c1, %c0_17, %c0_18] : memref<4x8x72xf32, #tpu.memory_space<vmem>>, vector<1x8x72xf32>
    %50 = vector.shape_cast %49 : vector<1x8x72xf32> to vector<8x72xf32>
    %c1_19 = arith.constant 1 : index
    %c0_20 = arith.constant 0 : index
    %c0_21 = arith.constant 0 : index
    %51 = vector.load %arg6[%c1_19, %c0_20, %c0_21] : memref<4x8x1xf32, #tpu.memory_space<vmem>>, vector<1x8x1xf32>
    %52 = vector.shape_cast %51 : vector<1x8x1xf32> to vector<8x1xf32>
    %c17_i32_22 = arith.constant 17 : i32
    %53 = tpu.dynamic_rotate %48 by %c17_i32_22 dim 1 : vector<8x512xf32>, i32 -> vector<8x512xf32>
    %c16_i32_23 = arith.constant 16 : i32
    %54 = tpu.dynamic_rotate %48 by %c16_i32_23 dim 1 : vector<8x512xf32>, i32 -> vector<8x512xf32>
    %c15_i32_24 = arith.constant 15 : i32
    %55 = tpu.dynamic_rotate %48 by %c15_i32_24 dim 1 : vector<8x512xf32>, i32 -> vector<8x512xf32>
    %c1_i32_25 = arith.constant 1 : i32
    %56 = tpu.dynamic_rotate %48 by %c1_i32_25 dim 1 : vector<8x512xf32>, i32 -> vector<8x512xf32>
    %c511_i32_26 = arith.constant 511 : i32
    %57 = tpu.dynamic_rotate %48 by %c511_i32_26 dim 1 : vector<8x512xf32>, i32 -> vector<8x512xf32>
    %c497_i32_27 = arith.constant 497 : i32
    %58 = tpu.dynamic_rotate %48 by %c497_i32_27 dim 1 : vector<8x512xf32>, i32 -> vector<8x512xf32>
    %c496_i32_28 = arith.constant 496 : i32
    %59 = tpu.dynamic_rotate %48 by %c496_i32_28 dim 1 : vector<8x512xf32>, i32 -> vector<8x512xf32>
    %c495_i32_29 = arith.constant 495 : i32
    %60 = tpu.dynamic_rotate %48 by %c495_i32_29 dim 1 : vector<8x512xf32>, i32 -> vector<8x512xf32>
    %61 = vector.shape_cast %53 : vector<8x512xf32> to vector<1x8x512xf32>
    %62 = vector.shape_cast %54 : vector<8x512xf32> to vector<1x8x512xf32>
    %63 = vector.shape_cast %55 : vector<8x512xf32> to vector<1x8x512xf32>
    %64 = vector.shape_cast %56 : vector<8x512xf32> to vector<1x8x512xf32>
    %65 = vector.shape_cast %48 : vector<8x512xf32> to vector<1x8x512xf32>
    %66 = vector.shape_cast %57 : vector<8x512xf32> to vector<1x8x512xf32>
    %67 = vector.shape_cast %58 : vector<8x512xf32> to vector<1x8x512xf32>
    %68 = vector.shape_cast %59 : vector<8x512xf32> to vector<1x8x512xf32>
    %69 = vector.shape_cast %60 : vector<8x512xf32> to vector<1x8x512xf32>
    %70 = tpu.concatenate %61, %62, %63, %64, %65, %66, %67, %68, %69 in 0 : vector<1x8x512xf32>, vector<1x8x512xf32>, vector<1x8x512xf32>, vector<1x8x512xf32>, vector<1x8x512xf32>, vector<1x8x512xf32>, vector<1x8x512xf32>, vector<1x8x512xf32>, vector<1x8x512xf32> -> vector<9x8x512xf32>
    %71 = vector.broadcast %14 : vector<9x1x512xf32> to vector<9x8x512xf32>
    %72 = arith.mulf %70, %71 : vector<9x8x512xf32>
    %73 = vector.shape_cast %72 : vector<9x8x512xf32> to vector<72x512xf32>
    %cst_30 = arith.constant dense<0.000000e+00> : vector<8x512xf32>
    %74 = tpu.matmul %50, %73, %cst_30 {dimension_numbers = #tpu.dot_dimension_numbers<[1], [0], [0], [1], [0, 0, 1, 1], [], []>} : vector<8x72xf32>, vector<72x512xf32>, vector<8x512xf32> -> vector<8x512xf32>
    %75 = vector.broadcast %52 : vector<8x1xf32> to vector<8x512xf32>
    %76 = arith.addf %74, %75 : vector<8x512xf32>
    %77 = arith.negf %76 : vector<8x512xf32>
    %78 = math.exp %77 : vector<8x512xf32>
    %cst_31 = arith.constant 1.000000e+00 : f32
    %79 = vector.broadcast %cst_31 : f32 to vector<8x512xf32>
    %80 = arith.addf %79, %78 : vector<8x512xf32>
    %81 = arith.divf %79, %80 : vector<8x512xf32>
    %82 = arith.mulf %76, %81 : vector<8x512xf32>
    %83 = arith.addf %13, %82 : vector<8x512xf32>
    %c2 = arith.constant 2 : index
    %c0_32 = arith.constant 0 : index
    %c0_33 = arith.constant 0 : index
    %84 = vector.load %arg5[%c2, %c0_32, %c0_33] : memref<4x8x72xf32, #tpu.memory_space<vmem>>, vector<1x8x72xf32>
    %85 = vector.shape_cast %84 : vector<1x8x72xf32> to vector<8x72xf32>
    %c2_34 = arith.constant 2 : index
    %c0_35 = arith.constant 0 : index
    %c0_36 = arith.constant 0 : index
    %86 = vector.load %arg6[%c2_34, %c0_35, %c0_36] : memref<4x8x1xf32, #tpu.memory_space<vmem>>, vector<1x8x1xf32>
    %87 = vector.shape_cast %86 : vector<1x8x1xf32> to vector<8x1xf32>
    %c17_i32_37 = arith.constant 17 : i32
    %88 = tpu.dynamic_rotate %83 by %c17_i32_37 dim 1 : vector<8x512xf32>, i32 -> vector<8x512xf32>
    %c16_i32_38 = arith.constant 16 : i32
    %89 = tpu.dynamic_rotate %83 by %c16_i32_38 dim 1 : vector<8x512xf32>, i32 -> vector<8x512xf32>
    %c15_i32_39 = arith.constant 15 : i32
    %90 = tpu.dynamic_rotate %83 by %c15_i32_39 dim 1 : vector<8x512xf32>, i32 -> vector<8x512xf32>
    %c1_i32_40 = arith.constant 1 : i32
    %91 = tpu.dynamic_rotate %83 by %c1_i32_40 dim 1 : vector<8x512xf32>, i32 -> vector<8x512xf32>
    %c511_i32_41 = arith.constant 511 : i32
    %92 = tpu.dynamic_rotate %83 by %c511_i32_41 dim 1 : vector<8x512xf32>, i32 -> vector<8x512xf32>
    %c497_i32_42 = arith.constant 497 : i32
    %93 = tpu.dynamic_rotate %83 by %c497_i32_42 dim 1 : vector<8x512xf32>, i32 -> vector<8x512xf32>
    %c496_i32_43 = arith.constant 496 : i32
    %94 = tpu.dynamic_rotate %83 by %c496_i32_43 dim 1 : vector<8x512xf32>, i32 -> vector<8x512xf32>
    %c495_i32_44 = arith.constant 495 : i32
    %95 = tpu.dynamic_rotate %83 by %c495_i32_44 dim 1 : vector<8x512xf32>, i32 -> vector<8x512xf32>
    %96 = vector.shape_cast %88 : vector<8x512xf32> to vector<1x8x512xf32>
    %97 = vector.shape_cast %89 : vector<8x512xf32> to vector<1x8x512xf32>
    %98 = vector.shape_cast %90 : vector<8x512xf32> to vector<1x8x512xf32>
    %99 = vector.shape_cast %91 : vector<8x512xf32> to vector<1x8x512xf32>
    %100 = vector.shape_cast %83 : vector<8x512xf32> to vector<1x8x512xf32>
    %101 = vector.shape_cast %92 : vector<8x512xf32> to vector<1x8x512xf32>
    %102 = vector.shape_cast %93 : vector<8x512xf32> to vector<1x8x512xf32>
    %103 = vector.shape_cast %94 : vector<8x512xf32> to vector<1x8x512xf32>
    %104 = vector.shape_cast %95 : vector<8x512xf32> to vector<1x8x512xf32>
    %105 = tpu.concatenate %96, %97, %98, %99, %100, %101, %102, %103, %104 in 0 : vector<1x8x512xf32>, vector<1x8x512xf32>, vector<1x8x512xf32>, vector<1x8x512xf32>, vector<1x8x512xf32>, vector<1x8x512xf32>, vector<1x8x512xf32>, vector<1x8x512xf32>, vector<1x8x512xf32> -> vector<9x8x512xf32>
    %106 = vector.broadcast %14 : vector<9x1x512xf32> to vector<9x8x512xf32>
    %107 = arith.mulf %105, %106 : vector<9x8x512xf32>
    %108 = vector.shape_cast %107 : vector<9x8x512xf32> to vector<72x512xf32>
    %cst_45 = arith.constant dense<0.000000e+00> : vector<8x512xf32>
    %109 = tpu.matmul %85, %108, %cst_45 {dimension_numbers = #tpu.dot_dimension_numbers<[1], [0], [0], [1], [0, 0, 1, 1], [], []>} : vector<8x72xf32>, vector<72x512xf32>, vector<8x512xf32> -> vector<8x512xf32>
    %110 = vector.broadcast %87 : vector<8x1xf32> to vector<8x512xf32>
    %111 = arith.addf %109, %110 : vector<8x512xf32>
    %112 = arith.negf %111 : vector<8x512xf32>
    %113 = math.exp %112 : vector<8x512xf32>
    %cst_46 = arith.constant 1.000000e+00 : f32
    %114 = vector.broadcast %cst_46 : f32 to vector<8x512xf32>
    %115 = arith.addf %114, %113 : vector<8x512xf32>
    %116 = arith.divf %114, %115 : vector<8x512xf32>
    %117 = arith.mulf %111, %116 : vector<8x512xf32>
    %c3 = arith.constant 3 : index
    %c0_47 = arith.constant 0 : index
    %c0_48 = arith.constant 0 : index
    %118 = vector.load %arg5[%c3, %c0_47, %c0_48] : memref<4x8x72xf32, #tpu.memory_space<vmem>>, vector<1x8x72xf32>
    %119 = vector.shape_cast %118 : vector<1x8x72xf32> to vector<8x72xf32>
    %c3_49 = arith.constant 3 : index
    %c0_50 = arith.constant 0 : index
    %c0_51 = arith.constant 0 : index
    %120 = vector.load %arg6[%c3_49, %c0_50, %c0_51] : memref<4x8x1xf32, #tpu.memory_space<vmem>>, vector<1x8x1xf32>
    %121 = vector.shape_cast %120 : vector<1x8x1xf32> to vector<8x1xf32>
    %c17_i32_52 = arith.constant 17 : i32
    %122 = tpu.dynamic_rotate %117 by %c17_i32_52 dim 1 : vector<8x512xf32>, i32 -> vector<8x512xf32>
    %c16_i32_53 = arith.constant 16 : i32
    %123 = tpu.dynamic_rotate %117 by %c16_i32_53 dim 1 : vector<8x512xf32>, i32 -> vector<8x512xf32>
    %c15_i32_54 = arith.constant 15 : i32
    %124 = tpu.dynamic_rotate %117 by %c15_i32_54 dim 1 : vector<8x512xf32>, i32 -> vector<8x512xf32>
    %c1_i32_55 = arith.constant 1 : i32
    %125 = tpu.dynamic_rotate %117 by %c1_i32_55 dim 1 : vector<8x512xf32>, i32 -> vector<8x512xf32>
    %c511_i32_56 = arith.constant 511 : i32
    %126 = tpu.dynamic_rotate %117 by %c511_i32_56 dim 1 : vector<8x512xf32>, i32 -> vector<8x512xf32>
    %c497_i32_57 = arith.constant 497 : i32
    %127 = tpu.dynamic_rotate %117 by %c497_i32_57 dim 1 : vector<8x512xf32>, i32 -> vector<8x512xf32>
    %c496_i32_58 = arith.constant 496 : i32
    %128 = tpu.dynamic_rotate %117 by %c496_i32_58 dim 1 : vector<8x512xf32>, i32 -> vector<8x512xf32>
    %c495_i32_59 = arith.constant 495 : i32
    %129 = tpu.dynamic_rotate %117 by %c495_i32_59 dim 1 : vector<8x512xf32>, i32 -> vector<8x512xf32>
    %130 = vector.shape_cast %122 : vector<8x512xf32> to vector<1x8x512xf32>
    %131 = vector.shape_cast %123 : vector<8x512xf32> to vector<1x8x512xf32>
    %132 = vector.shape_cast %124 : vector<8x512xf32> to vector<1x8x512xf32>
    %133 = vector.shape_cast %125 : vector<8x512xf32> to vector<1x8x512xf32>
    %134 = vector.shape_cast %117 : vector<8x512xf32> to vector<1x8x512xf32>
    %135 = vector.shape_cast %126 : vector<8x512xf32> to vector<1x8x512xf32>
    %136 = vector.shape_cast %127 : vector<8x512xf32> to vector<1x8x512xf32>
    %137 = vector.shape_cast %128 : vector<8x512xf32> to vector<1x8x512xf32>
    %138 = vector.shape_cast %129 : vector<8x512xf32> to vector<1x8x512xf32>
    %139 = tpu.concatenate %130, %131, %132, %133, %134, %135, %136, %137, %138 in 0 : vector<1x8x512xf32>, vector<1x8x512xf32>, vector<1x8x512xf32>, vector<1x8x512xf32>, vector<1x8x512xf32>, vector<1x8x512xf32>, vector<1x8x512xf32>, vector<1x8x512xf32>, vector<1x8x512xf32> -> vector<9x8x512xf32>
    %140 = vector.broadcast %14 : vector<9x1x512xf32> to vector<9x8x512xf32>
    %141 = arith.mulf %139, %140 : vector<9x8x512xf32>
    %142 = vector.shape_cast %141 : vector<9x8x512xf32> to vector<72x512xf32>
    %cst_60 = arith.constant dense<0.000000e+00> : vector<8x512xf32>
    %143 = tpu.matmul %119, %142, %cst_60 {dimension_numbers = #tpu.dot_dimension_numbers<[1], [0], [0], [1], [0, 0, 1, 1], [], []>} : vector<8x72xf32>, vector<72x512xf32>, vector<8x512xf32> -> vector<8x512xf32>
    %144 = vector.broadcast %121 : vector<8x1xf32> to vector<8x512xf32>
    %145 = arith.addf %143, %144 : vector<8x512xf32>
    %146 = arith.negf %145 : vector<8x512xf32>
    %147 = math.exp %146 : vector<8x512xf32>
    %cst_61 = arith.constant 1.000000e+00 : f32
    %148 = vector.broadcast %cst_61 : f32 to vector<8x512xf32>
    %149 = arith.addf %148, %147 : vector<8x512xf32>
    %150 = arith.divf %148, %149 : vector<8x512xf32>
    %151 = arith.mulf %145, %150 : vector<8x512xf32>
    %152 = arith.addf %83, %151 : vector<8x512xf32>
    %153 = tpu.concatenate %12, %13, %83, %152 in 0 : vector<8x512xf32>, vector<8x512xf32>, vector<8x512xf32>, vector<8x512xf32> -> vector<32x512xf32>
    %c0_62 = arith.constant 0 : index
    %c0_63 = arith.constant 0 : index
    %154 = vector.load %arg7[%c0_62, %c0_63] : memref<16x32xf32, #tpu.memory_space<vmem>>, vector<16x32xf32>
    %cst_64 = arith.constant dense<0.000000e+00> : vector<16x512xf32>
    %155 = tpu.matmul %154, %153, %cst_64 {dimension_numbers = #tpu.dot_dimension_numbers<[1], [0], [0], [1], [0, 0, 1, 1], [], []>} : vector<16x32xf32>, vector<32x512xf32>, vector<16x512xf32> -> vector<16x512xf32>
    %c0_65 = arith.constant 0 : index
    %c0_66 = arith.constant 0 : index
    %156 = vector.load %arg8[%c0_65, %c0_66] : memref<16x1xf32, #tpu.memory_space<vmem>>, vector<16x1xf32>
    %157 = vector.broadcast %156 : vector<16x1xf32> to vector<16x512xf32>
    %158 = arith.addf %155, %157 : vector<16x512xf32>
    %159 = arith.negf %158 : vector<16x512xf32>
    %160 = math.exp %159 : vector<16x512xf32>
    %cst_67 = arith.constant 1.000000e+00 : f32
    %161 = vector.broadcast %cst_67 : f32 to vector<16x512xf32>
    %162 = arith.addf %161, %160 : vector<16x512xf32>
    %163 = arith.divf %161, %162 : vector<16x512xf32>
    %164 = arith.mulf %158, %163 : vector<16x512xf32>
    %c0_68 = arith.constant 0 : index
    %c0_69 = arith.constant 0 : index
    %165 = vector.load %arg9[%c0_68, %c0_69] : memref<16x512xf32, #tpu.memory_space<vmem>>, vector<16x512xf32>
    tpu.vector_store %arg9[%c0_68, %c0_69], %164 {strides = array<i32>} : memref<16x512xf32, #tpu.memory_space<vmem>>, vector<16x512xf32>,
    return
  }
  func.func @transform_0(%arg0: i32) -> (i32, i32) {
    %c0_i32 = arith.constant 0 : i32
    %c0_i32_0 = arith.constant 0 : i32
    return %c0_i32, %arg0 : i32, i32
  }
  func.func @transform_1(%arg0: i32) -> (i32, i32, i32) {
    %c0_i32 = arith.constant 0 : i32
    %c0_i32_0 = arith.constant 0 : i32
    %c0_i32_1 = arith.constant 0 : i32
    %c0_i32_2 = arith.constant 0 : i32
    return %c0_i32, %c0_i32_0, %c0_i32_1 : i32, i32, i32
  }
  func.func @transform_2(%arg0: i32) -> (i32, i32) {
    %c0_i32 = arith.constant 0 : i32
    %c0_i32_0 = arith.constant 0 : i32
    %c0_i32_1 = arith.constant 0 : i32
    return %c0_i32, %c0_i32_0 : i32, i32
  }
  func.func @transform_3(%arg0: i32) -> (i32, i32) {
    %c0_i32 = arith.constant 0 : i32
    %c0_i32_0 = arith.constant 0 : i32
    %c0_i32_1 = arith.constant 0 : i32
    return %c0_i32, %c0_i32_0 : i32, i32
  }
  func.func @transform_4(%arg0: i32) -> (i32, i32, i32) {
    %c0_i32 = arith.constant 0 : i32
    %c0_i32_0 = arith.constant 0 : i32
    %c0_i32_1 = arith.constant 0 : i32
    %c0_i32_2 = arith.constant 0 : i32
    return %c0_i32, %c0_i32_0, %c0_i32_1 : i32, i32, i32
  }
  func.func @transform_5(%arg0: i32) -> (i32, i32, i32) {
    %c0_i32 = arith.constant 0 : i32
    %c0_i32_0 = arith.constant 0 : i32
    %c0_i32_1 = arith.constant 0 : i32
    %c0_i32_2 = arith.constant 0 : i32
    return %c0_i32, %c0_i32_0, %c0_i32_1 : i32, i32, i32
  }
  func.func @transform_6(%arg0: i32) -> (i32, i32) {
    %c0_i32 = arith.constant 0 : i32
    %c0_i32_0 = arith.constant 0 : i32
    %c0_i32_1 = arith.constant 0 : i32
    return %c0_i32, %c0_i32_0 : i32, i32
  }
  func.func @transform_7(%arg0: i32) -> (i32, i32) {
    %c0_i32 = arith.constant 0 : i32
    %c0_i32_0 = arith.constant 0 : i32
    %c0_i32_1 = arith.constant 0 : i32
    return %c0_i32, %c0_i32_0 : i32, i32
  }
  func.func @transform_8(%arg0: i32) -> (i32, i32) {
    %c0_i32 = arith.constant 0 : i32
    %c0_i32_0 = arith.constant 0 : i32
    return %c0_i32, %arg0 : i32, i32
  }
}

</mosaic_0001>

<bundles_post_ra>
// kernel: _lambda_.1
= control target key start
LH: loop header
LB: loop body
LE: loop exit
PB: predicated region body
PF: predicated region fallthrough
CT: control target
= control target key end

     0   :  { %s2848_s27 = smov 0   ;;  %s2850_s28 = smov 0   ;;  %s3953_s0 = inlined_call_operand.vmem [shape: f32[16,1024], index: 0, kind: input, shape index: {}]   ;;  %s3954_s1 = inlined_call_operand.vmem [shape: f32[9,1,512], index: 1, kind: input, shape index: {}]   ;;  %s3955_s2 = inlined_call_operand.vmem [shape: f32[16,16], index: 2, kind: input, shape index: {}]   ;;  %s3956_s3 = inlined_call_operand.vmem [shape: f32[16,1], index: 3, kind: input, shape index: {}]   ;;  %s3957_s4 = inlined_call_operand.vmem [shape: f32[4,8,72], index: 4, kind: input, shape index: {}]   ;;  %s3958_s5 = inlined_call_operand.vmem [shape: f32[4,8,1], index: 5, kind: input, shape index: {}]   ;;  %s3959_s6 = inlined_call_operand.vmem [shape: f32[16,32], index: 6, kind: input, shape index: {}]   ;;  %s3960_s7 = inlined_call_operand.vmem [shape: f32[16,1], index: 7, kind: input, shape index: {}]   ;;  %s3961_s8 = inlined_call_operand.vmem [shape: f32[16,1024], index: 8, kind: output, shape index: {}]  }
   0x1   :  { %s2852_s29 = smov 0  }
   0x2 LB: > { %s2382_s30 = sadd.s32 4294967295, %s2791_s29   ;;  %s2865_s9 = sadd.s32 1, %s2791_s29   ;;  %s2791_s29 = sphi %s2852_s29, %s4022_s29   ;;  %s2787_s28 = sphi %s2850_s28, %s4021_s28   ;;  %s2783_s27 = sphi %s2848_s27, %s4020_s27  }
   0x3   : > { %s22_s10 = ssub.s32 %s2791_s29, %s2865_s9  ;;  %s25_s11 = sadd.s32 1, %s2787_s28 }
   0x4   : > { %p23_p0 = scmp.eq.s32.totalorder %s22_s10, 0  ;;  %p32_p1 = scmp.ne.s32.totalorder %s2787_s28, %s2783_s27 }
   0x5   : > { %p33_p2 = scmp.eq.s32.totalorder %s2791_s29, 0  ;;  %p209_p3 = scmp.eq.s32.totalorder %s2382_s30, 1 }
   0x6   : > { %s2876_s12 = scalar_select %p23_p0, %s2787_s28, %s25_s11  }
   0x7   : > { %p34_p4 = por %p33_p2, %p32_p1  ;;  %p2878_p5 = por %p209_p3, %p32_p1 }
   0x8   : > { %p2385_p6 = scmp.ge.s32.totalorder %s2791_s29, 2 }
   0xa   : > { %252 = sbr.rel (%p2385_p6) target bundleno = 25 (0x19), region = 44 }
  0x11   : > { %255 = sbr.rel (!%p34_p4) target bundleno = 25 (0x19), region = 48  ;;  %s257_s14 = sand.u32 (%p34_p4), 1, %s2787_s28  }
  0x12   : > { %s2451_s15 = sshll.u32 (%p34_p4), %s2791_s29, 5  ;;  %s2386_s16 = sshll.u32 (%p34_p4), %s257_s14, 6 }
  0x13   : > { %s262_s19 = scalar_lea.vmem (%p34_p4), %s3953_s0, %s2451_s15  ;;  %s259_s20 = scalar_lea.vmem (%p34_p4), [#allocation2], %s2386_s16 }
  0x14   : > { %v275_v0 = vld [vmem:[%s262_s19] sm:$0xff] (%p34_p4)  ;;  %v277_v1 = vld [vmem:[%s262_s19 + $0x8] sm:$0xff] (%p34_p4)  ;;  %v279_v2 = vld [vmem:[%s262_s19 + $0x10] sm:$0xff] (%p34_p4) }
  0x15   : > { %276 = vst [vmem:[%s259_s20] sm:$0xff] (%p34_p4), %v275_v0  ;;  %278 = vst [vmem:[%s259_s20 + $0x8] sm:$0xff] (%p34_p4), %v277_v1  ;;  %v281_v3 = vld [vmem:[%s262_s19 + $0x18] sm:$0xff] (%p34_p4)  ;;  %v283_v4 = vld [vmem:[%s262_s19 + $0x40] sm:$0xff] (%p34_p4) }
  0x16   : > { %280 = vst [vmem:[%s259_s20 + $0x10] sm:$0xff] (%p34_p4), %v279_v2  ;;  %v285_v5 = vld [vmem:[%s262_s19 + $0x48] sm:$0xff] (%p34_p4)  ;;  %282 = vst [vmem:[%s259_s20 + $0x18] sm:$0xff] (%p34_p4), %v281_v3  ;;  %v287_v6 = vld [vmem:[%s262_s19 + $0x50] sm:$0xff] (%p34_p4) }
  0x17   : > { %284 = vst [vmem:[%s259_s20 + $0x20] sm:$0xff] (%p34_p4), %v283_v4  ;;  %286 = vst [vmem:[%s259_s20 + $0x28] sm:$0xff] (%p34_p4), %v285_v5  ;;  %v289_v7 = vld [vmem:[%s262_s19 + $0x58] sm:$0xff] (%p34_p4) }
  0x18   : > { %288 = vst [vmem:[%s259_s20 + $0x30] sm:$0xff] %v287_v6  ;;  %290 = vst [vmem:[%s259_s20 + $0x38] sm:$0xff] %v289_v7 }
  0x19 PF: > { %p2389_p7 = scmp.ge.s32.totalorder %s2791_s29, 1  ;;  %p295_p8 = scmp.lt.s32.totalorder %s2791_s29, 3 }
  0x1b   : > { %p296_p9 = pnand %p2389_p7, %p295_p8 }
  0x1d   : > { %299 = sbr.rel (%p296_p9) target bundleno = 2251 (0x8cb), region = 71 }
  0x24   : > { %s302_s21 = sand.u32 1, %s2783_s27   ;;  %v3962_v8 = vmov 0.0   ;;  %v347_v9 = vld [vmem:[%s3956_s3 + $0x8] sm:$0xff]  ;;  %v2794_v10 = vmov 0   ;;  %v344_v23 = vld [vmem:[%s3955_s2] sm:$0xff]  ;;  %vm358_vm0 = vcmask 130048   ;;  %v594_v60 = vlaneseq }
  0x25   : > { %s2891_s22 = sshll.u32 %s302_s21, 6  ;;  %429 = vmatprep.mubr.f32.mxu0 %v3962_v8  ;;  %506 = vmatprep.mubr.f32.mxu1 %v3962_v8  ;;  %v345_v24 = vld [vmem:[%s3955_s2 + $0x8] sm:$0xff]  ;;  %s2795_s14 = smov 17   ;;  %v585_v58 = vld [vmem:[%s3958_s5] sm:$0xff]  ;;  %vm922_vm9 = vcmask 588800   ;;  %vm2060_vm10 = vcmask 261120  }
  0x26   : > { %2639 = vset.pattern.permute.xlu0 %v2794_v10  ;;  %2640 = vset.pattern.permute.xlu1 %v2794_v10  ;;  %s304_s25 = scalar_lea.vmem [#allocation2], %s2891_s22  ;;  %s2796_s15 = smov 16   ;;  %v2996_v62 = vand.u32 127, %v594_v60  ;;  %v702_v63 = vshrl.u32 %v594_v60, 7  ;;  %v3003_v2 = vld [vmem:[%s3954_s1] sm:$0xf] }
  0x27   : > { %v337_v11 = vld [vmem:[%s304_s25 + $0x8] sm:$0xff]  ;;  %v339_v13 = vld [vmem:[%s304_s25 + $0x18] sm:$0xff]  ;;  %355 = vperm.xlu0 %2639, %v347_v9   ;;  %v336_v16 = vld [vmem:[%s304_s25] sm:$0xff]  ;;  %s2797_s16 = smov 15   ;;  %s2798_s17 = smov 1  }
  0x28   : > { %v341_v12 = vld [vmem:[%s304_s25 + $0x28] sm:$0xff]  ;;  %v343_v15 = vld [vmem:[%s304_s25 + $0x38] sm:$0xff]  ;;  %v340_v17 = vld [vmem:[%s304_s25 + $0x20] sm:$0xff]  ;;  %s2799_s18 = smov 127   ;;  %s2800_s19 = smov 113   ;;  %vm596_vm1 = vcmp.lt.s32.totalorder %v2996_v62, 17 }
  0x29   : > { %v2453_v14 = vpack.c.bf16 %v341_v12, %v337_v11  ;;  %v2457_v18 = vpack.c.bf16 %v343_v15, %v339_v13  ;;  %v2455_v19 = vpack.c.bf16 %v340_v17, %v336_v16  ;;  %v338_v20 = vld [vmem:[%s304_s25 + $0x10] sm:$0xff]  ;;  %s2801_s20 = smov 112   ;;  %s2802_s21 = smov 111   ;;  %v3006_v3 = vsub.s32 3, %v702_v63  ;;  %v576_v6 = vld [vmem:[%s3954_s1 + $0x4] sm:$0xf] }
  0x2a   : > { %v342_v21 = vld [vmem:[%s304_s25 + $0x30] sm:$0xff]  ;;  %vm609_vm2 = vcmp.lt.s32.totalorder %v2996_v62, 16  ;;  %vm622_vm3 = vcmp.lt.s32.totalorder %v2996_v62, 15  ;;  %vm635_vm4 = vcmp.lt.s32.totalorder %v2996_v62, 1  ;;  %vm648_vm5 = vcmp.lt.s32.totalorder %v2996_v62, 127  ;;  %s3918_s24 = scalar_lea.vmem [#allocation3], %s2891_s22 }
  0x2b   : > { %2454 = vmatprep.subr.bf16.mxu0 %v2453_v14  ;;  %v2459_v22 = vpack.c.bf16 %v342_v21, %v338_v20  ;;  %2458 = vmatprep.subr.bf16.mxu1 %v2457_v18  ;;  %v3013_v7 = vrot.slane %v3003_v2, %v3006_v3  ;;  %v3016_v9 = vrot.slane %v576_v6, %v3006_v3  ;;  %v3036_v21 = vsub.s32 0, %v702_v63  ;;  %s2452_s22 = sshll.u32 (%p2878_p5), %s2382_s30, 5 }
  0x2c   : > { %2456 = vmatpush1.bf16.msra.mxu0 %v2455_v19  ;;  %vm661_vm6 = vcmp.lt.s32.totalorder %v2996_v62, 113  ;;  %vm674_vm7 = vcmp.lt.s32.totalorder %v2996_v62, 112  ;;  %vm687_vm8 = vcmp.lt.s32.totalorder %v2996_v62, 111 }
  0x2d   : > { %2460 = vmatpush1.bf16.msra.mxu1 %v2459_v22  ;;  %v3038_v22 = vsub.s32 2, %v702_v63 }
  0x2f   : > { %2392 = vmatmul.mubr.msk.f32.vlgmr.msra.gmra.mrb[0].mxu0 %vm358_vm0, %v344_v23 }
  0x30   : > { %2394 = vmatmul.mubr.msk.f32.vlgmr.msra.gmra.mrb[0].mxu1 %vm358_vm0, %v344_v23  ;;  %435 = vmatprep.mubr.f32.mxu0 %v3962_v8 }
  0x31   : > { %512 = vmatprep.mubr.f32.mxu1 %v3962_v8 }
  0x33   : > { %2393 = vmatmul.mubr.msk.f32.gmra.mrb[2].mxu0 %vm358_vm0, %v345_v24 }
  0x34   : > { %2395 = vmatmul.mubr.msk.f32.gmra.mrb[2].mxu1 %vm358_vm0, %v345_v24  ;;  %990 = vmatprep.mubr.f32.mxu0 %v3962_v8  ;;  %v3040_v24 = vsub.s32 1, %v702_v63 }
  0x35   : > { %1061 = vmatprep.mubr.f32.mxu1 %v3962_v8 }
  0xa6   : > { %v356_v29 = vpop.permute.xlu0 %355 }
 0x102   : > { %v2909_v25 = vpop.f32.mrb[0].mxu0 }
 0x103   : > { %3987 = vst [vmem:[#allocation4_spill] sm:$0xff] %v2909_v25  ;;  %v2911_v26 = vpop.f32.mrb[0].mxu1  ;;  %v2913_v27 = vpop.f32.mrb[1].mxu0 }
 0x104   : > { %3988 = vst [vmem:[#allocation5_spill] sm:$0xff] %v2911_v26  ;;  %3989 = vst [vmem:[#allocation6_spill] sm:$0xff] %v2913_v27  ;;  %v2915_v28 = vpop.f32.mrb[1].mxu1 }
 0x105   : > { %3990 = vst [vmem:[#allocation7_spill] sm:$0xff] %v2915_v28 }
 0x106   : > { %v437_v30 = vpop.f32.mrb[2].mxu0 }
 0x107   : > { %v438_v31 = vadd.f32 %v437_v30, %v356_v29  ;;  %v514_v32 = vpop.f32.mrb[2].mxu1  ;;  %v439_v33 = vpop.f32.mrb[3].mxu0  ;;  %v579_v30 = vld [vmem:[%s3954_s1 + $0x10] sm:$0xf] }
 0x108   : > { %v515_v34 = vadd.f32 %v514_v32, %v356_v29  ;;  %v440_v35 = vadd.f32 %v439_v33, %v356_v29  ;;  %v516_v36 = vpop.f32.mrb[3].mxu1  ;;  %v3048_v32 = vrot.slane %v579_v30, %v3036_v21  ;;  %v3051_v33 = vrot.slane %v579_v30, %v3038_v22 }
 0x109   : > { %v2400_v37 = vmul.f32 -1.442695, %v438_v31  ;;  %v517_v38 = vadd.f32 %v516_v36, %v356_v29  ;;  %v3059_v36 = vrot.slane %v579_v30, %v3040_v24 }
 0x10a   : > { %v2402_v39 = vmul.f32 -1.442695, %v515_v34  ;;  %v2401_v40 = vmul.f32 -1.442695, %v440_v35  ;;  %3995 = vst [vmem:[#allocation12_spill] sm:$0xff] %v3048_v32  ;;  %3996 = vst [vmem:[#allocation13_spill] sm:$0xff] %v3051_v33 }
 0x10b   : > { %2641 = vpow2.f32 %v2400_v37  ;;  %v2403_v41 = vmul.f32 -1.442695, %v517_v38  ;;  %3998 = vst [vmem:[#allocation15_spill] sm:$0xff] %v3059_v36  ;;  %v3063_v37 = vrot.slane %v3003_v2, %v3036_v21 }
 0x10c   : > { %2643 = vpow2.f32 %v2402_v39  ;;  %v577_v39 = vld [vmem:[%s3954_s1 + $0x8] sm:$0xf] }
 0x10d   : > { %2645 = vpow2.f32 %v2401_v40  ;;  %v3072_v40 = vrot.slane %v576_v6, %v3038_v22 }
 0x10e   : > { %2647 = vpow2.f32 %v2403_v41  ;;  %v3075_v41 = vrot.slane %v576_v6, %v3036_v21 }
 0x115   : > { %v2642_v42 = vpop.eup %2641 }
 0x116   : > { %v2644_v43 = vpop.eup %2643  ;;  %v547_v44 = vadd.f32 1.0, %v2642_v42  ;;  %v578_v42 = vld [vmem:[%s3954_s1 + $0xc] sm:$0xf] }
 0x117   : > { %v2646_v45 = vpop.eup %2645  ;;  %v549_v46 = vadd.f32 1.0, %v2644_v43  ;;  %v3120_v63 = vrot.slane %v578_v42, %v3040_v24 }
 0x118   : > { %v2648_v47 = vpop.eup %2647  ;;  %2649 = vrcp.f32 %v547_v44  ;;  %v548_v49 = vadd.f32 1.0, %v2646_v45 }
 0x119   : > { %2651 = vrcp.f32 %v549_v46  ;;  %v550_v48 = vadd.f32 1.0, %v2648_v47 }
 0x11b   : > { %2653 = vrcp.f32 %v550_v48 }
 0x11c   : > { %2655 = vrcp.f32 %v548_v49 }
 0x122   : > { %v2650_v50 = vpop.eup %2649 }
 0x123   : > { %v2652_v51 = vpop.eup %2651  ;;  %v2917_v52 = vmul.f32 %v2650_v50, %v438_v31  ;;  %v3101_v50 = vrot.slane %v577_v39, %v3040_v24 }
 0x124   : > { %v2919_v53 = vmul.f32 %v2652_v51, %v515_v34  ;;  %v3104_v51 = vrot.slane %v577_v39, %v3038_v22 }
 0x125   : > { %3991 = vst [vmem:[#allocation8_spill] sm:$0xff] %v2917_v52  ;;  %v2654_v54 = vpop.eup %2653  ;;  %586 = vrot.lane.b32.xlu0 %v2917_v52, %s2795_s14  ;;  %v3082_v44 = vmul.f32 %v3048_v32, %v2917_v52 }
 0x126   : > { %3992 = vst [vmem:[#allocation9_spill] sm:$0xff] %v2919_v53  ;;  %590 = vrot.lane.b32.xlu1 %v2919_v53, %s2795_s14  ;;  %v2925_v55 = vmul.f32 %v2654_v54, %v517_v38  ;;  %v2656_v56 = vpop.eup %2655  ;;  %v3066_v38 = vrot.slane %v576_v6, %v3040_v24  ;;  %v3086_v45 = vmul.f32 %v3051_v33, %v2919_v53  ;;  %v582_v33 = vld [vmem:[%s3954_s1 + $0x1c] sm:$0xf] }
 0x127   : > { %v2931_v57 = vmul.f32 %v2656_v56, %v440_v35  ;;  %v3056_v35 = vrot.slane %v579_v30, %v3006_v3  ;;  %v3107_v54 = vrot.slane %v577_v39, %v3036_v21  ;;  %v3110_v56 = vrot.slane %v577_v39, %v3006_v3 }
 0x128   : > { %3993 = vst [vmem:[#allocation10_spill] sm:$0xff] %v2925_v55  ;;  %v3123_v6 = vrot.slane %v578_v42, %v3038_v22 }
 0x129   : > { %592 = vrot.lane.b32.xlu0 %v2925_v55, %s2795_s14  ;;  %3994 = vst [vmem:[#allocation11_spill] sm:$0xff] %v2931_v57  ;;  %3997 = vst [vmem:[#allocation14_spill] sm:$0xff] %v3056_v35  ;;  %v3094_v48 = vmul.f32 %v3056_v35, %v2925_v55  ;;  %v3098_v49 = vmul.f32 %v3059_v36, %v2931_v57 }
 0x12a   : > { %601 = vrot.lane.b32.xlu1 %v2917_v52, %s2796_s15 }
 0x12d   : > { %603 = vrot.lane.b32.xlu0 %v2931_v57, %s2796_s15 }
 0x12e   : > { %605 = vrot.lane.b32.xlu1 %v2919_v53, %s2796_s15 }
 0x131   : > { %607 = vrot.lane.b32.xlu0 %v2925_v55, %s2796_s15 }
 0x132   : > { %614 = vrot.lane.b32.xlu1 %v2917_v52, %s2797_s16 }
 0x135   : > { %616 = vrot.lane.b32.xlu0 %v2931_v57, %s2797_s16 }
 0x136   : > { %618 = vrot.lane.b32.xlu1 %v2919_v53, %s2797_s16 }
 0x139   : > { %620 = vrot.lane.b32.xlu0 %v2925_v55, %s2797_s16 }
 0x13a   : > { %627 = vrot.lane.b32.xlu1 %v2917_v52, %s2798_s17 }
 0x13d   : > { %629 = vrot.lane.b32.xlu0 %v2931_v57, %s2798_s17 }
 0x13e   : > { %631 = vrot.lane.b32.xlu1 %v2919_v53, %s2798_s17 }
 0x141   : > { %633 = vrot.lane.b32.xlu0 %v2925_v55, %s2798_s17 }
 0x142   : > { %640 = vrot.lane.b32.xlu1 %v2917_v52, %s2799_s18 }
 0x145   : > { %642 = vrot.lane.b32.xlu0 %v2931_v57, %s2799_s18 }
 0x146   : > { %644 = vrot.lane.b32.xlu1 %v2919_v53, %s2799_s18 }
 0x149   : > { %646 = vrot.lane.b32.xlu0 %v2925_v55, %s2799_s18 }
 0x14a   : > { %653 = vrot.lane.b32.xlu1 %v2917_v52, %s2800_s19 }
 0x14d   : > { %655 = vrot.lane.b32.xlu0 %v2931_v57, %s2800_s19 }
 0x14e   : > { %588 = vrot.lane.b32.xlu1 %v2931_v57, %s2795_s14 }
 0x151   : > { %659 = vrot.lane.b32.xlu0 %v2925_v55, %s2800_s19 }
 0x152   : > { %657 = vrot.lane.b32.xlu1 %v2919_v53, %s2800_s19 }
 0x155   : > { %668 = vrot.lane.b32.xlu0 %v2931_v57, %s2801_s20 }
 0x156   : > { %666 = vrot.lane.b32.xlu1 %v2917_v52, %s2801_s20 }
 0x159   : > { %672 = vrot.lane.b32.xlu0 %v2925_v55, %s2801_s20 }
 0x15a   : > { %670 = vrot.lane.b32.xlu1 %v2919_v53, %s2801_s20 }
 0x15d   : > { %681 = vrot.lane.b32.xlu0 %v2931_v57, %s2802_s21 }
 0x15e   : > { %679 = vrot.lane.b32.xlu1 %v2917_v52, %s2802_s21 }
 0x161   : > { %685 = vrot.lane.b32.xlu0 %v2925_v55, %s2802_s21 }
 0x162   : > { %683 = vrot.lane.b32.xlu1 %v2919_v53, %s2802_s21 }
 0x166   : > { %919 = vperm.xlu1 %2640, %v585_v58   ;;  %v580_v58 = vld [vmem:[%s3954_s1 + $0x14] sm:$0xf] }
 0x167   : > { %v3142_v30 = vrot.slane %v580_v58, %v3036_v21  ;;  %v3145_v39 = vrot.slane %v580_v58, %v3040_v24  ;;  %v3151_v8 = vrot.slane %v580_v58, %v3038_v22  ;;  %v3154_v28 = vrot.slane %v580_v58, %v3006_v3 }
 0x197   : > { %v2992_v59 = vpop.permute.xlu0 %586 }
 0x198   : > { %v2994_v61 = vpop.permute.xlu1 %590 }
 0x19b   : > { %v593_v0 = vpop.permute.xlu0 %592 }
 0x19c   : > { %v2998_v1 = vpop.permute.xlu1 %601  ;;  %v597_v10 = vsel %vm596_vm1, %v2994_v61, %v593_v0  ;;  %v600_v60 = vsel %vm596_vm1, %v593_v0, %v2992_v59  ;;  %v581_v0 = vld [vmem:[%s3954_s1 + $0x18] sm:$0xf] }
 0x19d   : > { %v884_v14 = vmul.f32 %v3013_v7, %v597_v10  ;;  %v3171_v26 = vrot.slane %v581_v0, %v3036_v21  ;;  %v3178_v53 = vrot.slane %v581_v0, %v3040_v24 }
 0x19f   : > { %v604_v4 = vpop.permute.xlu0 %603 }
 0x1a0   : > { %v606_v5 = vpop.permute.xlu1 %605 }
 0x1a3   : > { %v608_v11 = vpop.permute.xlu0 %607 }
 0x1a4   : > { %v3022_v12 = vpop.permute.xlu1 %614  ;;  %v610_v13 = vsel %vm609_vm2, %v606_v5, %v608_v11  ;;  %v613_v46 = vsel %vm609_vm2, %v608_v11, %v2998_v1  ;;  %v3127_v11 = vrot.slane %v578_v42, %v3036_v21 }
 0x1a5   : > { %v888_v15 = vmul.f32 %v3016_v9, %v610_v13  ;;  %v885_v10 = vmul.f32 %v3075_v41, %v613_v46  ;;  %v3130_v13 = vrot.slane %v578_v42, %v3006_v3  ;;  %v881_v46 = vmul.f32 %v3063_v37, %v600_v60 }
 0x1a6   : > { %v3168_v60 = vrot.slane %v3003_v2, %v3038_v22 }
 0x1a7   : > { %v3028_v16 = vpop.permute.xlu0 %616  ;;  %v2477_v17 = vpack.c.bf16 %v888_v15, %v884_v14  ;;  %3999 = vst [vmem:[#allocation16_spill] sm:$0xff] %v3130_v13  ;;  %v611_v15 = vsel %vm609_vm2, %v604_v4, %v606_v5  ;;  %v3158_v5 = vrot.slane %v3003_v2, %v3040_v24  ;;  %v2463_v25 = vpack.c.bf16 %v885_v10, %v881_v46 }
 0x1a8   : > { %v3030_v18 = vpop.permute.xlu1 %618  ;;  %v887_v27 = vmul.f32 %v3072_v40, %v611_v15  ;;  %v625_v2 = vsel %vm622_vm3, %v3022_v12, %v3028_v16 }
 0x1a9   : > { %2478 = vmatprep.subr.bf16.mxu1 %v2477_v17  ;;  %v612_v17 = vsel %vm609_vm2, %v2998_v1, %v604_v4  ;;  %v624_v57 = vsel %vm622_vm3, %v3028_v16, %v3030_v18 }
 0x1aa   : > { %v886_v58 = vmul.f32 %v3066_v38, %v612_v17 }
 0x1ab   : > { %v3032_v19 = vpop.permute.xlu0 %620 }
 0x1ac   : > { %v3034_v20 = vpop.permute.xlu1 %627  ;;  %v623_v10 = vsel %vm622_vm3, %v3030_v18, %v3032_v19 }
 0x1af   : > { %v630_v23 = vpop.permute.xlu0 %629 }
 0x1b0   : > { %v632_v29 = vpop.permute.xlu1 %631  ;;  %v638_v1 = vsel %vm635_vm4, %v3034_v20, %v630_v23 }
 0x1b1   : > { %v637_v15 = vsel %vm635_vm4, %v630_v23, %v632_v29  ;;  %v894_v46 = vmul.f32 %v3120_v63, %v638_v1 }
 0x1b3   : > { %v3045_v31 = vpop.permute.xlu0 %633 }
 0x1b4   : > { %v3053_v34 = vpop.permute.xlu1 %640  ;;  %v636_v4 = vsel %vm635_vm4, %v632_v29, %v3045_v31  ;;  %v639_v18 = vsel %vm635_vm4, %v3045_v31, %v3034_v20 }
 0x1b5   : > { %v896_v52 = vmul.f32 %v3130_v13, %v636_v4  ;;  %v890_v4 = vmul.f32 %v3101_v50, %v625_v2  ;;  %v893_v36 = vmul.f32 %v3127_v11, %v639_v18 }
 0x1b7   : > { %v643_v43 = vpop.permute.xlu0 %642 }
 0x1b8   : > { %v645_v47 = vpop.permute.xlu1 %644 }
 0x1b9   : > { %v650_v20 = vsel %vm648_vm5, %v643_v43, %v645_v47 }
 0x1ba   : > { %v902_v13 = vmul.f32 %v3145_v39, %v650_v20 }
 0x1bb   : > { %v647_v14 = vpop.permute.xlu0 %646 }
 0x1bc   : > { %v3147_v42 = vpop.permute.xlu1 %653  ;;  %v652_v23 = vsel %vm648_vm5, %v647_v14, %v3053_v34 }
 0x1bf   : > { %v3175_v55 = vpop.permute.xlu0 %655 }
 0x1c0   : > { %v589_v17 = vpop.permute.xlu1 %588 }
 0x1c1   : > { %v598_v35 = vsel %vm596_vm1, %v589_v17, %v2994_v61  ;;  %v599_v16 = vsel %vm596_vm1, %v2992_v59, %v589_v17  ;;  %v626_v59 = vsel %vm622_vm3, %v3032_v19, %v3022_v12  ;;  %v892_v61 = vmul.f32 %v3110_v56, %v623_v10 }
 0x1c2   : > { %v882_v29 = vmul.f32 %v3158_v5, %v599_v16  ;;  %v883_v1 = vmul.f32 %v3168_v60, %v598_v35  ;;  %v895_v17 = vmul.f32 %v3123_v6, %v637_v15  ;;  %v651_v16 = vsel %vm648_vm5, %v3053_v34, %v643_v43 }
 0x1c3   : > { %v660_v31 = vpop.permute.xlu0 %659  ;;  %v649_v12 = vsel %vm648_vm5, %v645_v47, %v647_v14  ;;  %v904_v19 = vmul.f32 %v3154_v28, %v652_v23  ;;  %v2481_v10 = vpack.c.bf16 %v896_v52, %v892_v61  ;;  %v891_v15 = vmul.f32 %v3104_v51, %v624_v57 }
 0x1c4   : > { %v2479_v35 = vpack.c.bf16 %v887_v27, %v883_v1  ;;  %v658_v32 = vpop.permute.xlu1 %657  ;;  %v2461_v2 = vpack.c.bf16 %v886_v58, %v882_v29  ;;  %v2465_v27 = vpack.c.bf16 %v894_v46, %v890_v4  ;;  %v889_v34 = vmul.f32 %v3107_v54, %v626_v59 }
 0x1c5   : > { %v901_v43 = vmul.f32 %v3142_v30, %v651_v16  ;;  %v3236_v47 = vrot.slane %v581_v0, %v3038_v22  ;;  %v2483_v57 = vpack.c.bf16 %v895_v17, %v891_v15  ;;  %v903_v14 = vmul.f32 %v3151_v8, %v649_v12 }
 0x1c6   : > { %2462 = vmatprep.subr.bf16.mxu0 %v2461_v2  ;;  %2480 = vmatpush1.bf16.msra.mxu1 %v2479_v35  ;;  %v3241_v58 = vrot.slane %v581_v0, %v3006_v3  ;;  %v3244_v46 = vrot.slane %v582_v33, %v3036_v21  ;;  %v2467_v23 = vpack.c.bf16 %v893_v36, %v889_v34 }
 0x1c7   : > { %2464 = vmatpush1.bf16.msra.mxu0 %v2463_v25  ;;  %2482 = vmatprep.subr.bf16.mxu1 %v2481_v10  ;;  %v669_v52 = vpop.permute.xlu0 %668  ;;  %v665_v25 = vsel %vm661_vm6, %v660_v31, %v3147_v42  ;;  %v2485_v29 = vpack.c.bf16 %v904_v19, %v3094_v48  ;;  %v3251_v1 = vrot.slane %v582_v33, %v3006_v3 }
 0x1c8   : > { %v667_v18 = vpop.permute.xlu1 %666  ;;  %2466 = vmatprep.subr.bf16.mxu0 %v2465_v27  ;;  %v3256_v0 = vrot.slane %v582_v33, %v3040_v24  ;;  %v2469_v59 = vpack.c.bf16 %v902_v13, %v3098_v49  ;;  %v3260_v36 = vrot.slane %v582_v33, %v3038_v22  ;;  %v2471_v61 = vpack.c.bf16 %v901_v43, %v3082_v44  ;;  %v583_v43 = vld [vmem:[%s3954_s1 + $0x20] sm:$0xf] }
 0x1c9   : > { %v677_v4 = vsel %vm674_vm7, %v667_v18, %v669_v52  ;;  %v663_v48 = vsel %vm661_vm6, %v3175_v55, %v658_v32  ;;  %v662_v20 = vsel %vm661_vm6, %v658_v32, %v660_v31  ;;  %v2487_v16 = vpack.c.bf16 %v903_v14, %v3086_v45 }
 0x1ca   : > { %2484 = vmatpush1.bf16.msra.mxu1 %v2483_v57  ;;  %v664_v33 = vsel %vm661_vm6, %v3147_v42, %v3175_v55  ;;  %v908_v49 = vmul.f32 %v3241_v58, %v665_v25  ;;  %v909_v35 = vmul.f32 %v3244_v46, %v677_v4  ;;  %v906_v2 = vmul.f32 %v3178_v53, %v663_v48 }
 0x1cb   : > { %2468 = vmatpush1.bf16.msra.mxu0 %v2467_v23  ;;  %2486 = vmatprep.subr.bf16.mxu1 %v2485_v29  ;;  %v673_v17 = vpop.permute.xlu0 %672  ;;  %v907_v55 = vmul.f32 %v3236_v47, %v662_v20  ;;  %v905_v19 = vmul.f32 %v3171_v26, %v664_v33  ;;  %v3292_v14 = vrot.slane %v583_v43, %v3006_v3  ;;  %v584_v20 = vld [vmem:[%s3957_s4] sm:$0xff] }
 0x1cc   : > { %v671_v44 = vpop.permute.xlu1 %670  ;;  %2470 = vmatprep.subr.bf16.mxu0 %v2469_v59  ;;  %v678_v13 = vsel %vm674_vm7, %v673_v17, %v667_v18  ;;  %v3295_v18 = vrot.slane %v583_v43, %v3038_v22  ;;  %v3298_v23 = vrot.slane %v583_v43, %v3040_v24  ;;  %v3301_v25 = vrot.slane %v583_v43, %v3036_v21 }
 0x1cd   : > { %v676_v32 = vsel %vm674_vm7, %v669_v52, %v671_v44  ;;  %v675_v45 = vsel %vm674_vm7, %v671_v44, %v673_v17  ;;  %v912_v31 = vmul.f32 %v3251_v1, %v678_v13  ;;  %v2475_v57 = vpack.c.bf16 %v909_v35, %v905_v19 }
 0x1ce   : > { %v910_v42 = vmul.f32 %v3256_v0, %v676_v32  ;;  %v911_v12 = vmul.f32 %v3260_v36, %v675_v45  ;;  %2488 = vmatpush1.bf16.msra.mxu1 %v2487_v16  ;;  %v4000_v16 = vmov 0.0  }
 0x1cf   : > { %2472 = vmatpush1.bf16.msra.mxu0 %v2471_v61  ;;  %v682_v10 = vpop.permute.xlu0 %681  ;;  %v2489_v15 = vpack.c.bf16 %v912_v31, %v908_v49 }
 0x1d0   : > { %v2491_v27 = vpack.c.bf16 %v911_v12, %v907_v55  ;;  %v680_v34 = vpop.permute.xlu1 %679  ;;  %v2473_v52 = vpack.c.bf16 %v910_v42, %v906_v2 }
 0x1d1   : > { %2490 = vmatprep.subr.bf16.mxu1 %v2489_v15  ;;  %v690_v4 = vsel %vm687_vm8, %v680_v34, %v682_v10 }
 0x1d2   : > { %2474 = vmatprep.subr.bf16.mxu0 %v2473_v52  ;;  %2492 = vmatpush1.bf16.msra.mxu1 %v2491_v27  ;;  %v913_v17 = vmul.f32 %v3301_v25, %v690_v4 }
 0x1d3   : > { %2476 = vmatpush1.bf16.msra.mxu0 %v2475_v57  ;;  %v686_v29 = vpop.permute.xlu0 %685 }
 0x1d4   : > { %v684_v59 = vpop.permute.xlu1 %683  ;;  %v691_v3 = vsel %vm687_vm8, %v686_v29, %v680_v34 }
 0x1d5   : > { %v689_v61 = vsel %vm687_vm8, %v682_v10, %v684_v59  ;;  %v688_v22 = vsel %vm687_vm8, %v684_v59, %v686_v29  ;;  %v916_v24 = vmul.f32 %v3292_v14, %v691_v3 }
 0x1d6   : > { %v915_v21 = vmul.f32 %v3295_v18, %v688_v22  ;;  %v914_v48 = vmul.f32 %v3298_v23, %v689_v61 }
 0x1d7   : > { %1013 = vmatprep.subr.mxu1 %v916_v24 }
 0x1d8   : > { %942 = vmatprep.subr.mxu0 %v914_v48  ;;  %1014 = vmatpush1.msra.mxu1 %v915_v21 }
 0x1d9   : > { %943 = vmatpush1.msra.mxu0 %v913_v17  ;;  %2405 = vmatmul.mubr.msk.f32.vlgmr.msra.gmra.mrb[4].mxu1 %vm922_vm9, %v584_v20 }
 0x1da   : > { %2404 = vmatmul.mubr.msk.f32.vlgmr.msra.gmra.mrb[4].mxu0 %vm922_vm9, %v584_v20  ;;  %1375 = vmatprep.mubr.f32.mxu1 %v4000_v16  ;;  %v2411_v20 = vld [vmem:[%s3958_s5 + $0x8] sm:$0xff] }
 0x1db   : > { %1304 = vmatprep.mubr.f32.mxu0 %v4000_v16 }
 0x1e5   : > { %v920_v33 = vpop.permute.xlu1 %919 }
 0x2ac   : > { %v1063_v49 = vpop.f32.mrb[4].mxu1 }
 0x2ad   : > { %v992_v44 = vpop.f32.mrb[4].mxu0  ;;  %v1064_v13 = vadd.f32 %v1063_v49, %v920_v33  ;;  %v1065_v35 = vpop.f32.mrb[5].mxu1 }
 0x2ae   : > { %v993_v32 = vadd.f32 %v992_v44, %v920_v33  ;;  %v994_v45 = vpop.f32.mrb[5].mxu0  ;;  %v1066_v31 = vadd.f32 %v1065_v35, %v920_v33 }
 0x2af   : > { %v2408_v2 = vmul.f32 -1.442695, %v1064_v13  ;;  %v995_v55 = vadd.f32 %v994_v45, %v920_v33 }
 0x2b0   : > { %v2406_v42 = vmul.f32 -1.442695, %v993_v32  ;;  %v2409_v12 = vmul.f32 -1.442695, %v1066_v31 }
 0x2b1   : > { %2657 = vpow2.f32 %v2408_v2  ;;  %v2407_v19 = vmul.f32 -1.442695, %v995_v55 }
 0x2b2   : > { %2659 = vpow2.f32 %v2406_v42 }
 0x2b3   : > { %2661 = vpow2.f32 %v2407_v19 }
 0x2b4   : > { %2663 = vpow2.f32 %v2409_v12 }
 0x2bb   : > { %v2658_v10 = vpop.eup %2657 }
 0x2bc   : > { %v2660_v15 = vpop.eup %2659  ;;  %v1082_v43 = vadd.f32 1.0, %v2658_v10 }
 0x2bd   : > { %v2662_v27 = vpop.eup %2661  ;;  %v1080_v34 = vadd.f32 1.0, %v2660_v15 }
 0x2be   : > { %v2664_v52 = vpop.eup %2663  ;;  %v1081_v57 = vadd.f32 1.0, %v2662_v27 }
 0x2bf   : > { %2665 = vrcp.f32 %v1080_v34  ;;  %v1083_v29 = vadd.f32 1.0, %v2664_v52 }
 0x2c0   : > { %2667 = vrcp.f32 %v1081_v57 }
 0x2c1   : > { %2669 = vrcp.f32 %v1082_v43 }
 0x2c2   : > { %2671 = vrcp.f32 %v1083_v29 }
 0x2c9   : > { %v2666_v4 = vpop.eup %2665 }
 0x2ca   : > { %v2668_v59 = vpop.eup %2667  ;;  %v3322_v3 = vmul.f32 %v2666_v4, %v993_v32 }
 0x2cb   : > { %v2670_v61 = vpop.eup %2669  ;;  %v3324_v22 = vmul.f32 %v2668_v59, %v995_v55 }
 0x2cc   : > { %v2672_v24 = vpop.eup %2671  ;;  %1100 = vrot.lane.b32.xlu0 %v3322_v3, %s2795_s14  ;;  %v3330_v21 = vmul.f32 %v2670_v61, %v1064_v13 }
 0x2cd   : > { %1102 = vrot.lane.b32.xlu1 %v3324_v22, %s2795_s14  ;;  %v3332_v48 = vmul.f32 %v2672_v24, %v1066_v31 }
 0x2d0   : > { %1104 = vrot.lane.b32.xlu0 %v3330_v21, %s2795_s14 }
 0x2d1   : > { %1106 = vrot.lane.b32.xlu1 %v3332_v48, %s2795_s14 }
 0x2d4   : > { %1112 = vrot.lane.b32.xlu0 %v3322_v3, %s2796_s15 }
 0x2d5   : > { %1114 = vrot.lane.b32.xlu1 %v3324_v22, %s2796_s15 }
 0x2d8   : > { %1116 = vrot.lane.b32.xlu0 %v3330_v21, %s2796_s15 }
 0x2d9   : > { %1118 = vrot.lane.b32.xlu1 %v3332_v48, %s2796_s15 }
 0x2dc   : > { %1124 = vrot.lane.b32.xlu0 %v3322_v3, %s2797_s16 }
 0x2dd   : > { %1126 = vrot.lane.b32.xlu1 %v3324_v22, %s2797_s16 }
 0x2e0   : > { %1128 = vrot.lane.b32.xlu0 %v3330_v21, %s2797_s16 }
 0x2e1   : > { %1130 = vrot.lane.b32.xlu1 %v3332_v48, %s2797_s16 }
 0x2e4   : > { %1136 = vrot.lane.b32.xlu0 %v3322_v3, %s2798_s17 }
 0x2e5   : > { %1138 = vrot.lane.b32.xlu1 %v3324_v22, %s2798_s17 }
 0x2e8   : > { %1140 = vrot.lane.b32.xlu0 %v3330_v21, %s2798_s17 }
 0x2e9   : > { %1142 = vrot.lane.b32.xlu1 %v3332_v48, %s2798_s17 }
 0x2ec   : > { %1148 = vrot.lane.b32.xlu0 %v3322_v3, %s2799_s18 }
 0x2ed   : > { %1150 = vrot.lane.b32.xlu1 %v3324_v22, %s2799_s18 }
 0x2f0   : > { %1152 = vrot.lane.b32.xlu0 %v3330_v21, %s2799_s18 }
 0x2f1   : > { %1154 = vrot.lane.b32.xlu1 %v3332_v48, %s2799_s18 }
 0x2f4   : > { %1160 = vrot.lane.b32.xlu0 %v3322_v3, %s2800_s19 }
 0x2f5   : > { %1162 = vrot.lane.b32.xlu1 %v3324_v22, %s2800_s19 }
 0x2f8   : > { %1164 = vrot.lane.b32.xlu0 %v3330_v21, %s2800_s19 }
 0x2f9   : > { %1166 = vrot.lane.b32.xlu1 %v3332_v48, %s2800_s19 }
 0x2fc   : > { %1172 = vrot.lane.b32.xlu0 %v3322_v3, %s2801_s20 }
 0x2fd   : > { %1174 = vrot.lane.b32.xlu1 %v3324_v22, %s2801_s20 }
 0x300   : > { %1176 = vrot.lane.b32.xlu0 %v3330_v21, %s2801_s20 }
 0x301   : > { %1178 = vrot.lane.b32.xlu1 %v3332_v48, %s2801_s20 }
 0x304   : > { %1184 = vrot.lane.b32.xlu0 %v3322_v3, %s2802_s21 }
 0x305   : > { %1186 = vrot.lane.b32.xlu1 %v3324_v22, %s2802_s21 }
 0x308   : > { %1188 = vrot.lane.b32.xlu0 %v3330_v21, %s2802_s21 }
 0x309   : > { %1190 = vrot.lane.b32.xlu1 %v3332_v48, %s2802_s21 }
 0x30c   : > { %1234 = vperm.xlu0 %2639, %v2411_v20  }
 0x33e   : > { %v1101_v17 = vpop.permute.xlu0 %1100 }
 0x33f   : > { %v1103_v33 = vpop.permute.xlu1 %1102 }
 0x340   : > { %v1110_v13 = vsel %vm596_vm1, %v1101_v17, %v1103_v33 }
 0x341   : > { %v1197_v31 = vmul.f32 %v1110_v13, %v3158_v5 }
 0x342   : > { %v1105_v49 = vpop.permute.xlu0 %1104 }
 0x343   : > { %v1107_v44 = vpop.permute.xlu1 %1106  ;;  %v1109_v19 = vsel %vm596_vm1, %v1103_v33, %v1105_v49 }
 0x344   : > { %v1108_v55 = vsel %vm596_vm1, %v1105_v49, %v1107_v44  ;;  %v1111_v42 = vsel %vm596_vm1, %v1107_v44, %v1101_v17  ;;  %v1198_v61 = vmul.f32 %v1109_v19, %v3168_v60 }
 0x345   : > { %v1196_v57 = vmul.f32 %v1111_v42, %v3063_v37  ;;  %v1199_v29 = vmul.f32 %v1108_v55, %v3013_v7 }
 0x346   : > { %v1113_v35 = vpop.permute.xlu0 %1112 }
 0x347   : > { %v1115_v32 = vpop.permute.xlu1 %1114 }
 0x348   : > { %v1122_v45 = vsel %vm609_vm2, %v1113_v35, %v1115_v32 }
 0x349   : > { %v1201_v2 = vmul.f32 %v1122_v45, %v3066_v38 }
 0x34a   : > { %v1117_v12 = vpop.permute.xlu0 %1116 }
 0x34b   : > { %v1121_v10 = vsel %vm609_vm2, %v1115_v32, %v1117_v12  ;;  %v1119_v15 = vpop.permute.xlu1 %1118  ;;  %v2493_v27 = vpack.c.bf16 %v1201_v2, %v1197_v31 }
 0x34c   : > { %v1202_v34 = vmul.f32 %v1121_v10, %v3072_v40  ;;  %v1120_v43 = vsel %vm609_vm2, %v1117_v12, %v1119_v15  ;;  %v1123_v52 = vsel %vm609_vm2, %v1119_v15, %v1113_v35 }
 0x34d   : > { %v1200_v4 = vmul.f32 %v1123_v52, %v3075_v41  ;;  %v1203_v59 = vmul.f32 %v1120_v43, %v3016_v9  ;;  %2494 = vmatprep.subr.bf16.mxu0 %v2493_v27 }
 0x34e   : > { %v1125_v24 = vpop.permute.xlu0 %1124  ;;  %v2511_v49 = vpack.c.bf16 %v1202_v34, %v1198_v61  ;;  %v4001_v61 = vld [vmem:[#allocation16_spill] sm:$0xff] }
 0x34f   : > { %v2495_v20 = vpack.c.bf16 %v1200_v4, %v1196_v57  ;;  %v1127_v17 = vpop.permute.xlu1 %1126  ;;  %v2509_v33 = vpack.c.bf16 %v1203_v59, %v1199_v29 }
 0x350   : > { %v1134_v35 = vsel %vm622_vm3, %v1125_v24, %v1127_v17 }
 0x351   : > { %2496 = vmatpush1.bf16.msra.mxu0 %v2495_v20  ;;  %2510 = vmatprep.subr.bf16.mxu1 %v2509_v33  ;;  %v1205_v2 = vmul.f32 %v1134_v35, %v3101_v50 }
 0x352   : > { %2512 = vmatpush1.bf16.msra.mxu1 %v2511_v49  ;;  %v1129_v44 = vpop.permute.xlu0 %1128 }
 0x353   : > { %v1131_v13 = vpop.permute.xlu1 %1130  ;;  %v1133_v10 = vsel %vm622_vm3, %v1127_v17, %v1129_v44 }
 0x354   : > { %v1132_v42 = vsel %vm622_vm3, %v1129_v44, %v1131_v13  ;;  %v1135_v12 = vsel %vm622_vm3, %v1131_v13, %v1125_v24  ;;  %v1206_v20 = vmul.f32 %v1133_v10, %v3104_v51 }
 0x355   : > { %v1204_v29 = vmul.f32 %v1135_v12, %v3107_v54  ;;  %v1207_v4 = vmul.f32 %v1132_v42, %v3110_v56 }
 0x356   : > { %v1137_v32 = vpop.permute.xlu0 %1136 }
 0x357   : > { %v1139_v45 = vpop.permute.xlu1 %1138 }
 0x358   : > { %v1146_v31 = vsel %vm635_vm4, %v1137_v32, %v1139_v45 }
 0x359   : > { %v1209_v55 = vmul.f32 %v1146_v31, %v3120_v63 }
 0x35a   : > { %v1141_v19 = vpop.permute.xlu0 %1140 }
 0x35b   : > { %v1145_v15 = vsel %vm635_vm4, %v1139_v45, %v1141_v19  ;;  %v1143_v27 = vpop.permute.xlu1 %1142  ;;  %v2497_v34 = vpack.c.bf16 %v1209_v55, %v1205_v2  ;;  %v4002_v2 = vld [vmem:[#allocation13_spill] sm:$0xff] }
 0x35c   : > { %v1210_v43 = vmul.f32 %v1145_v15, %v3123_v6  ;;  %v1144_v52 = vsel %vm635_vm4, %v1141_v19, %v1143_v27  ;;  %v1147_v57 = vsel %vm635_vm4, %v1143_v27, %v1137_v32  ;;  %v1214_v55 = vmul.f32 %v3330_v21, %v4002_v2  ;;  %v4003_v15 = vld [vmem:[#allocation15_spill] sm:$0xff]  ;;  %v4005_v21 = vld [vmem:[#allocation14_spill] sm:$0xff] }
 0x35d   : > { %v1208_v59 = vmul.f32 %v1147_v57, %v3127_v11  ;;  %v1211_v24 = vmul.f32 %v1144_v52, %v4001_v61  ;;  %2498 = vmatprep.subr.bf16.mxu0 %v2497_v34  ;;  %v1213_v27 = vmul.f32 %v3324_v22, %v4003_v15  ;;  %v4004_v34 = vld [vmem:[#allocation12_spill] sm:$0xff] }
 0x35e   : > { %v1149_v17 = vpop.permute.xlu0 %1148  ;;  %v2515_v13 = vpack.c.bf16 %v1210_v43, %v1206_v20  ;;  %v1212_v43 = vmul.f32 %v3322_v3, %v4004_v34 }
 0x35f   : > { %v2499_v33 = vpack.c.bf16 %v1208_v59, %v1204_v29  ;;  %v1151_v49 = vpop.permute.xlu1 %1150  ;;  %v2513_v44 = vpack.c.bf16 %v1211_v24, %v1207_v4  ;;  %v1215_v29 = vmul.f32 %v3332_v48, %v4005_v21 }
 0x360   : > { %v1158_v35 = vsel %vm648_vm5, %v1149_v17, %v1151_v49 }
 0x361   : > { %2500 = vmatpush1.bf16.msra.mxu0 %v2499_v33  ;;  %2514 = vmatprep.subr.bf16.mxu1 %v2513_v44  ;;  %v1216_v45 = vmul.f32 %v1158_v35, %v3142_v30 }
 0x362   : > { %2516 = vmatpush1.bf16.msra.mxu1 %v2515_v13  ;;  %v1153_v32 = vpop.permute.xlu0 %1152 }
 0x363   : > { %v1157_v31 = vsel %vm648_vm5, %v1151_v49, %v1153_v32  ;;  %v1155_v42 = vpop.permute.xlu1 %1154  ;;  %v2503_v24 = vpack.c.bf16 %v1216_v45, %v1212_v43 }
 0x364   : > { %v1217_v12 = vmul.f32 %v1157_v31, %v3145_v39  ;;  %v1156_v19 = vsel %vm648_vm5, %v1153_v32, %v1155_v42  ;;  %v1159_v10 = vsel %vm648_vm5, %v1155_v42, %v1149_v17 }
 0x365   : > { %v1218_v52 = vmul.f32 %v1156_v19, %v3151_v8  ;;  %v1219_v57 = vmul.f32 %v1159_v10, %v3154_v28 }
 0x366   : > { %v1161_v4 = vpop.permute.xlu0 %1160  ;;  %v2501_v59 = vpack.c.bf16 %v1217_v12, %v1213_v27 }
 0x367   : > { %v2519_v20 = vpack.c.bf16 %v1218_v52, %v1214_v55  ;;  %v1163_v33 = vpop.permute.xlu1 %1162  ;;  %v2517_v49 = vpack.c.bf16 %v1219_v57, %v1215_v29 }
 0x368   : > { %2502 = vmatprep.subr.bf16.mxu0 %v2501_v59  ;;  %v1170_v13 = vsel %vm661_vm6, %v1161_v4, %v1163_v33 }
 0x369   : > { %2504 = vmatpush1.bf16.msra.mxu0 %v2503_v24  ;;  %2518 = vmatprep.subr.bf16.mxu1 %v2517_v49  ;;  %v1220_v55 = vmul.f32 %v1170_v13, %v3171_v26 }
 0x36a   : > { %2520 = vmatpush1.bf16.msra.mxu1 %v2519_v20  ;;  %v1165_v22 = vpop.permute.xlu0 %1164 }
 0x36b   : > { %v1167_v17 = vpop.permute.xlu1 %1166  ;;  %v1169_v35 = vsel %vm661_vm6, %v1163_v33, %v1165_v22 }
 0x36c   : > { %v1168_v32 = vsel %vm661_vm6, %v1165_v22, %v1167_v17  ;;  %v1171_v45 = vsel %vm661_vm6, %v1167_v17, %v1161_v4  ;;  %v1221_v10 = vmul.f32 %v1169_v35, %v3178_v53 }
 0x36d   : > { %v1222_v57 = vmul.f32 %v1168_v32, %v3236_v47  ;;  %v1223_v29 = vmul.f32 %v1171_v45, %v3241_v58 }
 0x36e   : > { %v1173_v3 = vpop.permute.xlu0 %1172 }
 0x36f   : > { %v1175_v44 = vpop.permute.xlu1 %1174 }
 0x370   : > { %v1182_v48 = vsel %vm674_vm7, %v1173_v3, %v1175_v44 }
 0x371   : > { %v1224_v42 = vmul.f32 %v1182_v48, %v3244_v46 }
 0x372   : > { %v1177_v31 = vpop.permute.xlu0 %1176 }
 0x373   : > { %v1181_v12 = vsel %vm674_vm7, %v1175_v44, %v1177_v31  ;;  %v1179_v19 = vpop.permute.xlu1 %1178  ;;  %v2507_v33 = vpack.c.bf16 %v1224_v42, %v1220_v55 }
 0x374   : > { %v1225_v27 = vmul.f32 %v1181_v12, %v3256_v0  ;;  %v1180_v43 = vsel %vm674_vm7, %v1177_v31, %v1179_v19  ;;  %v1183_v52 = vsel %vm674_vm7, %v1179_v19, %v1173_v3  ;;  %v2410_v12 = vld [vmem:[%s3957_s4 + $0x8] sm:$0xff] }
 0x375   : > { %v1226_v4 = vmul.f32 %v1180_v43, %v3260_v36  ;;  %v1227_v59 = vmul.f32 %v1183_v52, %v3251_v1 }
 0x376   : > { %v1185_v24 = vpop.permute.xlu0 %1184  ;;  %v2505_v20 = vpack.c.bf16 %v1225_v27, %v1221_v10 }
 0x377   : > { %v2523_v49 = vpack.c.bf16 %v1226_v4, %v1222_v57  ;;  %v1187_v22 = vpop.permute.xlu1 %1186  ;;  %v2521_v17 = vpack.c.bf16 %v1227_v59, %v1223_v29 }
 0x378   : > { %2506 = vmatprep.subr.bf16.mxu0 %v2505_v20  ;;  %v1194_v3 = vsel %vm687_vm8, %v1185_v24, %v1187_v22 }
 0x379   : > { %2508 = vmatpush1.bf16.msra.mxu0 %v2507_v33  ;;  %2522 = vmatprep.subr.bf16.mxu1 %v2521_v17  ;;  %v1228_v31 = vmul.f32 %v1194_v3, %v3301_v25 }
 0x37a   : > { %2524 = vmatpush1.bf16.msra.mxu1 %v2523_v49  ;;  %v1189_v44 = vpop.permute.xlu0 %1188 }
 0x37b   : > { %v1193_v13 = vsel %vm687_vm8, %v1187_v22, %v1189_v44  ;;  %v1191_v48 = vpop.permute.xlu1 %1190 }
 0x37c   : > { %v1229_v35 = vmul.f32 %v1193_v13, %v3298_v23  ;;  %v1192_v32 = vsel %vm687_vm8, %v1189_v44, %v1191_v48  ;;  %v1195_v45 = vsel %vm687_vm8, %v1191_v48, %v1185_v24 }
 0x37d   : > { %v1230_v55 = vmul.f32 %v1192_v32, %v3295_v18  ;;  %v1231_v42 = vmul.f32 %v1195_v45, %v3292_v14 }
 0x37e   : > { %1256 = vmatprep.subr.mxu0 %v1229_v35 }
 0x37f   : > { %1257 = vmatpush1.msra.mxu0 %v1228_v31  ;;  %1327 = vmatprep.subr.mxu1 %v1231_v42 }
 0x380   : > { %2412 = vmatmul.mubr.msk.f32.vlgmr.msra.gmra.mrb[6].mxu0 %vm922_vm9, %v2410_v12  ;;  %1328 = vmatpush1.msra.mxu1 %v1230_v55 }
 0x381   : > { %2413 = vmatmul.mubr.msk.f32.vlgmr.msra.gmra.mrb[6].mxu1 %vm922_vm9, %v2410_v12  ;;  %1622 = vmatprep.mubr.f32.mxu0 %v4000_v16 }
 0x382   : > { %1693 = vmatprep.mubr.f32.mxu1 %v4000_v16 }
 0x38b   : > { %v1235_v19 = vpop.permute.xlu0 %1234 }
 0x453   : > { %v1306_v10 = vpop.f32.mrb[6].mxu0 }
 0x454   : > { %v1307_v27 = vadd.f32 %v1306_v10, %v1235_v19  ;;  %v1308_v43 = vpop.f32.mrb[7].mxu0  ;;  %v1377_v52 = vpop.f32.mrb[6].mxu1  ;;  %v4006_v10 = vld [vmem:[#allocation8_spill] sm:$0xff] }
 0x455   : > { %v1309_v57 = vadd.f32 %v1308_v43, %v1235_v19  ;;  %v1378_v29 = vadd.f32 %v1377_v52, %v1235_v19  ;;  %v1379_v4 = vpop.f32.mrb[7].mxu1 }
 0x456   : > { %v2414_v59 = vmul.f32 -1.442695, %v1307_v27  ;;  %v1380_v24 = vadd.f32 %v1379_v4, %v1235_v19  ;;  %v4007_v4 = vld [vmem:[#allocation11_spill] sm:$0xff] }
 0x457   : > { %v2415_v20 = vmul.f32 -1.442695, %v1309_v57  ;;  %v2416_v33 = vmul.f32 -1.442695, %v1378_v29 }
 0x458   : > { %2673 = vpow2.f32 %v2414_v59  ;;  %v2417_v49 = vmul.f32 -1.442695, %v1380_v24 }
 0x459   : > { %2675 = vpow2.f32 %v2415_v20 }
 0x45a   : > { %2677 = vpow2.f32 %v2416_v33  ;;  %v4008_v33 = vld [vmem:[#allocation9_spill] sm:$0xff] }
 0x45b   : > { %2679 = vpow2.f32 %v2417_v49 }
 0x462   : > { %v2674_v22 = vpop.eup %2673 }
 0x463   : > { %v2676_v17 = vpop.eup %2675  ;;  %v1394_v3 = vadd.f32 1.0, %v2674_v22 }
 0x464   : > { %v2678_v44 = vpop.eup %2677  ;;  %v1395_v13 = vadd.f32 1.0, %v2676_v17 }
 0x465   : > { %v2680_v48 = vpop.eup %2679  ;;  %2681 = vrcp.f32 %v1394_v3  ;;  %v1396_v35 = vadd.f32 1.0, %v2678_v44 }
 0x466   : > { %2683 = vrcp.f32 %v1395_v13  ;;  %v1397_v32 = vadd.f32 1.0, %v2680_v48 }
 0x467   : > { %2685 = vrcp.f32 %v1396_v35 }
 0x468   : > { %2687 = vrcp.f32 %v1397_v32 }
 0x46f   : > { %v2682_v45 = vpop.eup %2681 }
 0x470   : > { %v2684_v31 = vpop.eup %2683  ;;  %v1406_v55 = vmul.f32 %v2682_v45, %v1307_v27  ;;  %v4010_v27 = vld [vmem:[#allocation10_spill] sm:$0xff] }
 0x471   : > { %v2686_v42 = vpop.eup %2685  ;;  %v1407_v12 = vmul.f32 %v2684_v31, %v1309_v57 }
 0x472   : > { %v2688_v19 = vpop.eup %2687  ;;  %v3509_v43 = vadd.f32 %v1406_v55, %v4006_v10  ;;  %v1408_v52 = vmul.f32 %v2686_v42, %v1378_v29  ;;  %v2419_v29 = vld [vmem:[%s3958_s5 + $0x10] sm:$0xff] }
 0x473   : > { %v3512_v59 = vadd.f32 %v1407_v12, %v4007_v4  ;;  %v1409_v20 = vmul.f32 %v2688_v19, %v1380_v24 }
 0x474   : > { %1418 = vrot.lane.b32.xlu1 %v3509_v43, %s2795_s14  ;;  %v3519_v49 = vadd.f32 %v1408_v52, %v4008_v33 }
 0x475   : > { %1420 = vrot.lane.b32.xlu0 %v3512_v59, %s2795_s14  ;;  %v3522_v57 = vadd.f32 %v1409_v20, %v4010_v27 }
 0x476   : > { %4009 = vst [vmem:[#allocation16_spill] sm:$0xff] %v3519_v49 }
 0x477   : > { %4011 = vst [vmem:[#allocation13_spill] sm:$0xff] %v3522_v57 }
 0x478   : > { %1422 = vrot.lane.b32.xlu1 %v3519_v49, %s2795_s14 }
 0x479   : > { %1424 = vrot.lane.b32.xlu0 %v3522_v57, %s2795_s14 }
 0x47c   : > { %1430 = vrot.lane.b32.xlu1 %v3509_v43, %s2796_s15 }
 0x47d   : > { %1432 = vrot.lane.b32.xlu0 %v3512_v59, %s2796_s15 }
 0x480   : > { %1434 = vrot.lane.b32.xlu1 %v3519_v49, %s2796_s15 }
 0x481   : > { %1436 = vrot.lane.b32.xlu0 %v3522_v57, %s2796_s15 }
 0x484   : > { %1442 = vrot.lane.b32.xlu1 %v3509_v43, %s2797_s16 }
 0x485   : > { %1444 = vrot.lane.b32.xlu0 %v3512_v59, %s2797_s16 }
 0x488   : > { %1446 = vrot.lane.b32.xlu1 %v3519_v49, %s2797_s16 }
 0x489   : > { %1448 = vrot.lane.b32.xlu0 %v3522_v57, %s2797_s16 }
 0x48c   : > { %1454 = vrot.lane.b32.xlu1 %v3509_v43, %s2798_s17 }
 0x48d   : > { %1456 = vrot.lane.b32.xlu0 %v3512_v59, %s2798_s17 }
 0x490   : > { %1458 = vrot.lane.b32.xlu1 %v3519_v49, %s2798_s17 }
 0x491   : > { %1460 = vrot.lane.b32.xlu0 %v3522_v57, %s2798_s17 }
 0x494   : > { %1466 = vrot.lane.b32.xlu1 %v3509_v43, %s2799_s18 }
 0x495   : > { %1468 = vrot.lane.b32.xlu0 %v3512_v59, %s2799_s18 }
 0x498   : > { %1470 = vrot.lane.b32.xlu1 %v3519_v49, %s2799_s18 }
 0x499   : > { %1472 = vrot.lane.b32.xlu0 %v3522_v57, %s2799_s18 }
 0x49c   : > { %1478 = vrot.lane.b32.xlu1 %v3509_v43, %s2800_s19 }
 0x49d   : > { %1480 = vrot.lane.b32.xlu0 %v3512_v59, %s2800_s19 }
 0x4a0   : > { %1482 = vrot.lane.b32.xlu1 %v3519_v49, %s2800_s19 }
 0x4a1   : > { %1484 = vrot.lane.b32.xlu0 %v3522_v57, %s2800_s19 }
 0x4a4   : > { %1490 = vrot.lane.b32.xlu1 %v3509_v43, %s2801_s20 }
 0x4a5   : > { %1492 = vrot.lane.b32.xlu0 %v3512_v59, %s2801_s20 }
 0x4a8   : > { %1494 = vrot.lane.b32.xlu1 %v3519_v49, %s2801_s20 }
 0x4a9   : > { %1496 = vrot.lane.b32.xlu0 %v3522_v57, %s2801_s20 }
 0x4ac   : > { %1502 = vrot.lane.b32.xlu1 %v3509_v43, %s2802_s21 }
 0x4ad   : > { %1504 = vrot.lane.b32.xlu0 %v3512_v59, %s2802_s21 }
 0x4b0   : > { %1506 = vrot.lane.b32.xlu1 %v3519_v49, %s2802_s21 }
 0x4b1   : > { %1508 = vrot.lane.b32.xlu0 %v3522_v57, %s2802_s21 }
 0x4b4   : > { %1552 = vperm.xlu1 %2640, %v2419_v29  }
 0x4e6   : > { %v1419_v24 = vpop.permute.xlu1 %1418 }
 0x4e7   : > { %v1421_v22 = vpop.permute.xlu0 %1420 }
 0x4e8   : > { %v1428_v44 = vsel %vm596_vm1, %v1419_v24, %v1421_v22 }
 0x4e9   : > { %v1515_v32 = vmul.f32 %v1428_v44, %v3158_v5 }
 0x4ea   : > { %v1423_v17 = vpop.permute.xlu1 %1422 }
 0x4eb   : > { %v1425_v3 = vpop.permute.xlu0 %1424  ;;  %v1427_v12 = vsel %vm596_vm1, %v1421_v22, %v1423_v17 }
 0x4ec   : > { %v1426_v31 = vsel %vm596_vm1, %v1423_v17, %v1425_v3  ;;  %v1429_v55 = vsel %vm596_vm1, %v1425_v3, %v1419_v24  ;;  %v1516_v17 = vmul.f32 %v1427_v12, %v3168_v60 }
 0x4ed   : > { %v1514_v27 = vmul.f32 %v1429_v55, %v3063_v37  ;;  %v1517_v24 = vmul.f32 %v1426_v31, %v3013_v7 }
 0x4ee   : > { %v1431_v13 = vpop.permute.xlu1 %1430 }
 0x4ef   : > { %v1433_v48 = vpop.permute.xlu0 %1432 }
 0x4f0   : > { %v1440_v35 = vsel %vm609_vm2, %v1431_v13, %v1433_v48 }
 0x4f1   : > { %v1519_v45 = vmul.f32 %v1440_v35, %v3066_v38 }
 0x4f2   : > { %v1435_v42 = vpop.permute.xlu1 %1434 }
 0x4f3   : > { %v1439_v19 = vsel %vm609_vm2, %v1433_v48, %v1435_v42  ;;  %v1437_v52 = vpop.permute.xlu0 %1436  ;;  %v2525_v20 = vpack.c.bf16 %v1519_v45, %v1515_v32 }
 0x4f4   : > { %v1520_v29 = vmul.f32 %v1439_v19, %v3072_v40  ;;  %v1438_v44 = vsel %vm609_vm2, %v1435_v42, %v1437_v52  ;;  %v1441_v35 = vsel %vm609_vm2, %v1437_v52, %v1431_v13 }
 0x4f5   : > { %v1518_v3 = vmul.f32 %v1441_v35, %v3075_v41  ;;  %v1521_v22 = vmul.f32 %v1438_v44, %v3016_v9  ;;  %2526 = vmatprep.subr.bf16.mxu0 %v2525_v20 }
 0x4f6   : > { %v1443_v48 = vpop.permute.xlu1 %1442  ;;  %v2543_v33 = vpack.c.bf16 %v1520_v29, %v1516_v17 }
 0x4f7   : > { %v2527_v32 = vpack.c.bf16 %v1518_v3, %v1514_v27  ;;  %v1445_v45 = vpop.permute.xlu0 %1444  ;;  %v2541_v19 = vpack.c.bf16 %v1521_v22, %v1517_v24 }
 0x4f8   : > { %v1452_v31 = vsel %vm622_vm3, %v1443_v48, %v1445_v45 }
 0x4f9   : > { %2528 = vmatpush1.bf16.msra.mxu0 %v2527_v32  ;;  %2542 = vmatprep.subr.bf16.mxu1 %v2541_v19  ;;  %v1523_v12 = vmul.f32 %v1452_v31, %v3101_v50 }
 0x4fa   : > { %2544 = vmatpush1.bf16.msra.mxu1 %v2543_v33  ;;  %v1447_v13 = vpop.permute.xlu1 %1446 }
 0x4fb   : > { %v1449_v42 = vpop.permute.xlu0 %1448  ;;  %v1451_v35 = vsel %vm622_vm3, %v1445_v45, %v1447_v13 }
 0x4fc   : > { %v1450_v29 = vsel %vm622_vm3, %v1447_v13, %v1449_v42  ;;  %v1453_v33 = vsel %vm622_vm3, %v1449_v42, %v1443_v48  ;;  %v1524_v13 = vmul.f32 %v1451_v35, %v3104_v51 }
 0x4fd   : > { %v1522_v31 = vmul.f32 %v1453_v33, %v3107_v54  ;;  %v1525_v48 = vmul.f32 %v1450_v29, %v3110_v56  ;;  %v1530_v29 = vmul.f32 %v3509_v43, %v4004_v34 }
 0x4fe   : > { %v1455_v55 = vpop.permute.xlu1 %1454 }
 0x4ff   : > { %v1457_v52 = vpop.permute.xlu0 %1456 }
 0x500   : > { %v1464_v20 = vsel %vm635_vm4, %v1455_v55, %v1457_v52 }
 0x501   : > { %v1527_v27 = vmul.f32 %v1464_v20, %v3120_v63 }
 0x502   : > { %v1459_v44 = vpop.permute.xlu1 %1458 }
 0x503   : > { %v1463_v24 = vsel %vm635_vm4, %v1457_v52, %v1459_v44  ;;  %v1461_v3 = vpop.permute.xlu0 %1460  ;;  %v2529_v22 = vpack.c.bf16 %v1527_v27, %v1523_v12 }
 0x504   : > { %v1528_v17 = vmul.f32 %v1463_v24, %v3123_v6  ;;  %v1462_v32 = vsel %vm635_vm4, %v1459_v44, %v1461_v3  ;;  %v1465_v19 = vsel %vm635_vm4, %v1461_v3, %v1455_v55 }
 0x505   : > { %v1526_v42 = vmul.f32 %v1465_v19, %v3127_v11  ;;  %v1529_v45 = vmul.f32 %v1462_v32, %v4001_v61  ;;  %2530 = vmatprep.subr.bf16.mxu0 %v2529_v22  ;;  %v1531_v19 = vmul.f32 %v3512_v59, %v4003_v15 }
 0x506   : > { %v1467_v52 = vpop.permute.xlu1 %1466  ;;  %v2547_v24 = vpack.c.bf16 %v1528_v17, %v1524_v13 }
 0x507   : > { %v2531_v20 = vpack.c.bf16 %v1526_v42, %v1522_v31  ;;  %v1469_v12 = vpop.permute.xlu0 %1468  ;;  %v2545_v27 = vpack.c.bf16 %v1529_v45, %v1525_v48  ;;  %v1532_v31 = vmul.f32 %v3519_v49, %v4002_v2  ;;  %v1533_v45 = vmul.f32 %v3522_v57, %v4005_v21 }
 0x508   : > { %v1476_v44 = vsel %vm648_vm5, %v1467_v52, %v1469_v12 }
 0x509   : > { %2532 = vmatpush1.bf16.msra.mxu0 %v2531_v20  ;;  %2546 = vmatprep.subr.bf16.mxu1 %v2545_v27  ;;  %v1534_v33 = vmul.f32 %v1476_v44, %v3142_v30 }
 0x50a   : > { %2548 = vmatpush1.bf16.msra.mxu1 %v2547_v24  ;;  %v1471_v55 = vpop.permute.xlu1 %1470 }
 0x50b   : > { %v1475_v35 = vsel %vm648_vm5, %v1469_v12, %v1471_v55  ;;  %v1473_v3 = vpop.permute.xlu0 %1472  ;;  %v2535_v12 = vpack.c.bf16 %v1534_v33, %v1530_v29 }
 0x50c   : > { %v1535_v22 = vmul.f32 %v1475_v35, %v3145_v39  ;;  %v1474_v17 = vsel %vm648_vm5, %v1471_v55, %v1473_v3  ;;  %v1477_v32 = vsel %vm648_vm5, %v1473_v3, %v1467_v52 }
 0x50d   : > { %v1536_v48 = vmul.f32 %v1474_v17, %v3151_v8  ;;  %v1537_v42 = vmul.f32 %v1477_v32, %v3154_v28 }
 0x50e   : > { %v1479_v13 = vpop.permute.xlu1 %1478  ;;  %v2533_v20 = vpack.c.bf16 %v1535_v22, %v1531_v19 }
 0x50f   : > { %v2551_v27 = vpack.c.bf16 %v1536_v48, %v1532_v31  ;;  %v1481_v24 = vpop.permute.xlu0 %1480  ;;  %v2549_v44 = vpack.c.bf16 %v1537_v42, %v1533_v45 }
 0x510   : > { %2534 = vmatprep.subr.bf16.mxu0 %v2533_v20  ;;  %v1488_v17 = vsel %vm661_vm6, %v1479_v13, %v1481_v24 }
 0x511   : > { %2536 = vmatpush1.bf16.msra.mxu0 %v2535_v12  ;;  %2550 = vmatprep.subr.bf16.mxu1 %v2549_v44  ;;  %v1538_v31 = vmul.f32 %v1488_v17, %v3171_v26 }
 0x512   : > { %2552 = vmatpush1.bf16.msra.mxu1 %v2551_v27  ;;  %v1483_v52 = vpop.permute.xlu1 %1482 }
 0x513   : > { %v1485_v55 = vpop.permute.xlu0 %1484  ;;  %v1487_v29 = vsel %vm661_vm6, %v1481_v24, %v1483_v52 }
 0x514   : > { %v1486_v33 = vsel %vm661_vm6, %v1483_v52, %v1485_v55  ;;  %v1489_v22 = vsel %vm661_vm6, %v1485_v55, %v1479_v13  ;;  %v1539_v20 = vmul.f32 %v1487_v29, %v3178_v53 }
 0x515   : > { %v1540_v13 = vmul.f32 %v1486_v33, %v3236_v47  ;;  %v1541_v44 = vmul.f32 %v1489_v22, %v3241_v58 }
 0x516   : > { %v1491_v35 = vpop.permute.xlu1 %1490 }
 0x517   : > { %v1493_v3 = vpop.permute.xlu0 %1492 }
 0x518   : > { %v1500_v32 = vsel %vm674_vm7, %v1491_v35, %v1493_v3 }
 0x519   : > { %v1542_v48 = vmul.f32 %v1500_v32, %v3244_v46 }
 0x51a   : > { %v1495_v19 = vpop.permute.xlu1 %1494 }
 0x51b   : > { %v1499_v42 = vsel %vm674_vm7, %v1493_v3, %v1495_v19  ;;  %v1497_v45 = vpop.permute.xlu0 %1496  ;;  %v2539_v32 = vpack.c.bf16 %v1542_v48, %v1538_v31 }
 0x51c   : > { %v1543_v12 = vmul.f32 %v1499_v42, %v3256_v0  ;;  %v1498_v27 = vsel %vm674_vm7, %v1495_v19, %v1497_v45  ;;  %v1501_v24 = vsel %vm674_vm7, %v1497_v45, %v1491_v35 }
 0x51d   : > { %v1544_v52 = vmul.f32 %v1498_v27, %v3260_v36  ;;  %v1545_v55 = vmul.f32 %v1501_v24, %v3251_v1  ;;  %v2418_v24 = vld [vmem:[%s3957_s4 + $0x10] sm:$0xff] }
 0x51e   : > { %v1503_v3 = vpop.permute.xlu1 %1502  ;;  %v2537_v17 = vpack.c.bf16 %v1543_v12, %v1539_v20 }
 0x51f   : > { %v2555_v29 = vpack.c.bf16 %v1544_v52, %v1540_v13  ;;  %v1505_v57 = vpop.permute.xlu0 %1504  ;;  %v2553_v42 = vpack.c.bf16 %v1545_v55, %v1541_v44 }
 0x520   : > { %2538 = vmatprep.subr.bf16.mxu0 %v2537_v17  ;;  %v1512_v35 = vsel %vm687_vm8, %v1503_v3, %v1505_v57 }
 0x521   : > { %2540 = vmatpush1.bf16.msra.mxu0 %v2539_v32  ;;  %2554 = vmatprep.subr.bf16.mxu1 %v2553_v42  ;;  %v1546_v20 = vmul.f32 %v1512_v35, %v3301_v25 }
 0x522   : > { %2556 = vmatpush1.bf16.msra.mxu1 %v2555_v29  ;;  %v1507_v33 = vpop.permute.xlu1 %1506 }
 0x523   : > { %v1511_v22 = vsel %vm687_vm8, %v1505_v57, %v1507_v33  ;;  %v1509_v19 = vpop.permute.xlu0 %1508 }
 0x524   : > { %v1547_v45 = vmul.f32 %v1511_v22, %v3298_v23  ;;  %v1510_v31 = vsel %vm687_vm8, %v1507_v33, %v1509_v19  ;;  %v1513_v48 = vsel %vm687_vm8, %v1509_v19, %v1503_v3 }
 0x525   : > { %v1548_v12 = vmul.f32 %v1510_v31, %v3295_v18  ;;  %v1549_v27 = vmul.f32 %v1513_v48, %v3292_v14 }
 0x526   : > { %1574 = vmatprep.subr.mxu0 %v1547_v45 }
 0x527   : > { %1575 = vmatpush1.msra.mxu0 %v1546_v20  ;;  %1645 = vmatprep.subr.mxu1 %v1549_v27 }
 0x528   : > { %2420 = vmatmul.mubr.msk.f32.vlgmr.msra.gmra.mrb[8].mxu0 %vm922_vm9, %v2418_v24  ;;  %1646 = vmatpush1.msra.mxu1 %v1548_v12 }
 0x529   : > { %2421 = vmatmul.mubr.msk.f32.vlgmr.msra.gmra.mrb[8].mxu1 %vm922_vm9, %v2418_v24  ;;  %1936 = vmatprep.mubr.f32.mxu0 %v4000_v16 }
 0x52a   : > { %2007 = vmatprep.mubr.f32.mxu1 %v4000_v16 }
 0x533   : > { %v1553_v57 = vpop.permute.xlu1 %1552 }
 0x5fb   : > { %v1624_v13 = vpop.f32.mrb[8].mxu0 }
 0x5fc   : > { %v1625_v44 = vadd.f32 %v1624_v13, %v1553_v57  ;;  %v1626_v52 = vpop.f32.mrb[9].mxu0  ;;  %v1695_v55 = vpop.f32.mrb[8].mxu1 }
 0x5fd   : > { %v1627_v3 = vadd.f32 %v1626_v52, %v1553_v57  ;;  %v1696_v17 = vadd.f32 %v1695_v55, %v1553_v57  ;;  %v1697_v32 = vpop.f32.mrb[9].mxu1 }
 0x5fe   : > { %v2422_v29 = vmul.f32 -1.442695, %v1625_v44  ;;  %v1698_v42 = vadd.f32 %v1697_v32, %v1553_v57 }
 0x5ff   : > { %v2423_v35 = vmul.f32 -1.442695, %v1627_v3  ;;  %v2424_v33 = vmul.f32 -1.442695, %v1696_v17 }
 0x600   : > { %2689 = vpow2.f32 %v2422_v29  ;;  %v2425_v22 = vmul.f32 -1.442695, %v1698_v42 }
 0x601   : > { %2691 = vpow2.f32 %v2423_v35 }
 0x602   : > { %2693 = vpow2.f32 %v2424_v33 }
 0x603   : > { %2695 = vpow2.f32 %v2425_v22 }
 0x60a   : > { %v2690_v19 = vpop.eup %2689 }
 0x60b   : > { %v2692_v45 = vpop.eup %2691  ;;  %v1712_v31 = vadd.f32 1.0, %v2690_v19 }
 0x60c   : > { %v2694_v48 = vpop.eup %2693  ;;  %v1713_v20 = vadd.f32 1.0, %v2692_v45 }
 0x60d   : > { %v2696_v12 = vpop.eup %2695  ;;  %2697 = vrcp.f32 %v1712_v31  ;;  %v1714_v27 = vadd.f32 1.0, %v2694_v48 }
 0x60e   : > { %2699 = vrcp.f32 %v1713_v20  ;;  %v1715_v24 = vadd.f32 1.0, %v2696_v12 }
 0x60f   : > { %2701 = vrcp.f32 %v1714_v27 }
 0x610   : > { %2703 = vrcp.f32 %v1715_v24 }
 0x617   : > { %v2698_v57 = vpop.eup %2697 }
 0x618   : > { %v2700_v13 = vpop.eup %2699  ;;  %v3698_v52 = vmul.f32 %v2698_v57, %v1625_v44  ;;  %v346_v44 = vld [vmem:[%s3956_s3] sm:$0xff] }
 0x619   : > { %v2702_v55 = vpop.eup %2701  ;;  %v3700_v32 = vmul.f32 %v2700_v13, %v1627_v3  ;;  %v2427_v3 = vld [vmem:[%s3958_s5 + $0x18] sm:$0xff] }
 0x61a   : > { %v2704_v29 = vpop.eup %2703  ;;  %1732 = vrot.lane.b32.xlu0 %v3698_v52, %s2795_s14  ;;  %v3706_v35 = vmul.f32 %v2702_v55, %v1696_v17  ;;  %v2048_v17 = vld [vmem:[%s3960_s7] sm:$0xff] }
 0x61b   : > { %1734 = vrot.lane.b32.xlu1 %v3700_v32, %s2795_s14  ;;  %v3708_v33 = vmul.f32 %v2704_v29, %v1698_v42  ;;  %v2049_v42 = vld [vmem:[%s3960_s7 + $0x8] sm:$0xff] }
 0x61e   : > { %1736 = vrot.lane.b32.xlu0 %v3706_v35, %s2795_s14 }
 0x61f   : > { %1738 = vrot.lane.b32.xlu1 %v3708_v33, %s2795_s14 }
 0x622   : > { %1744 = vrot.lane.b32.xlu0 %v3698_v52, %s2796_s15 }
 0x623   : > { %1746 = vrot.lane.b32.xlu1 %v3700_v32, %s2796_s15 }
 0x626   : > { %1748 = vrot.lane.b32.xlu0 %v3706_v35, %s2796_s15 }
 0x627   : > { %1750 = vrot.lane.b32.xlu1 %v3708_v33, %s2796_s15 }
 0x62a   : > { %1756 = vrot.lane.b32.xlu0 %v3698_v52, %s2797_s16 }
 0x62b   : > { %1758 = vrot.lane.b32.xlu1 %v3700_v32, %s2797_s16 }
 0x62e   : > { %1760 = vrot.lane.b32.xlu0 %v3706_v35, %s2797_s16 }
 0x62f   : > { %1762 = vrot.lane.b32.xlu1 %v3708_v33, %s2797_s16  ;;  %s2294_s16 = scalar_lea.vmem (%p2878_p5), %s3961_s8, %s2452_s22 }
 0x632   : > { %1768 = vrot.lane.b32.xlu0 %v3698_v52, %s2798_s17 }
 0x633   : > { %1770 = vrot.lane.b32.xlu1 %v3700_v32, %s2798_s17 }
 0x636   : > { %1772 = vrot.lane.b32.xlu0 %v3706_v35, %s2798_s17 }
 0x637   : > { %1774 = vrot.lane.b32.xlu1 %v3708_v33, %s2798_s17 }
 0x63a   : > { %1780 = vrot.lane.b32.xlu0 %v3698_v52, %s2799_s18 }
 0x63b   : > { %1782 = vrot.lane.b32.xlu1 %v3700_v32, %s2799_s18 }
 0x63e   : > { %1784 = vrot.lane.b32.xlu0 %v3706_v35, %s2799_s18 }
 0x63f   : > { %1786 = vrot.lane.b32.xlu1 %v3708_v33, %s2799_s18 }
 0x642   : > { %1792 = vrot.lane.b32.xlu0 %v3698_v52, %s2800_s19 }
 0x643   : > { %1794 = vrot.lane.b32.xlu1 %v3700_v32, %s2800_s19 }
 0x646   : > { %1796 = vrot.lane.b32.xlu0 %v3706_v35, %s2800_s19 }
 0x647   : > { %1798 = vrot.lane.b32.xlu1 %v3708_v33, %s2800_s19 }
 0x64a   : > { %1804 = vrot.lane.b32.xlu0 %v3698_v52, %s2801_s20 }
 0x64b   : > { %1806 = vrot.lane.b32.xlu1 %v3700_v32, %s2801_s20 }
 0x64e   : > { %1808 = vrot.lane.b32.xlu0 %v3706_v35, %s2801_s20 }
 0x64f   : > { %1810 = vrot.lane.b32.xlu1 %v3708_v33, %s2801_s20 }
 0x652   : > { %1816 = vrot.lane.b32.xlu0 %v3698_v52, %s2802_s21 }
 0x653   : > { %1818 = vrot.lane.b32.xlu1 %v3700_v32, %s2802_s21 }
 0x656   : > { %1820 = vrot.lane.b32.xlu0 %v3706_v35, %s2802_s21 }
 0x657   : > { %1822 = vrot.lane.b32.xlu1 %v3708_v33, %s2802_s21 }
 0x65a   : > { %350 = vperm.xlu0 %2639, %v346_v44  }
 0x65b   : > { %1866 = vperm.xlu1 %2640, %v2427_v3  }
 0x65e   : > { %2052 = vperm.xlu0 %2639, %v2048_v17  }
 0x65f   : > { %2057 = vperm.xlu1 %2640, %v2049_v42  }
 0x68c   : > { %v1733_v22 = vpop.permute.xlu0 %1732 }
 0x68d   : > { %v1735_v19 = vpop.permute.xlu1 %1734 }
 0x68e   : > { %v1742_v48 = vsel %vm596_vm1, %v1733_v22, %v1735_v19 }
 0x68f   : > { %v1829_v24 = vmul.f32 %v1742_v48, %v3158_v5 }
 0x690   : > { %v1737_v45 = vpop.permute.xlu0 %1736 }
 0x691   : > { %v1739_v31 = vpop.permute.xlu1 %1738  ;;  %v1741_v44 = vsel %vm596_vm1, %v1735_v19, %v1737_v45 }
 0x692   : > { %v1740_v13 = vsel %vm596_vm1, %v1737_v45, %v1739_v31  ;;  %v1743_v55 = vsel %vm596_vm1, %v1739_v31, %v1733_v22  ;;  %v1830_v45 = vmul.f32 %v1741_v44, %v3168_v60 }
 0x693   : > { %v1828_v48 = vmul.f32 %v1743_v55, %v3063_v37  ;;  %v1831_v22 = vmul.f32 %v1740_v13, %v3013_v7 }
 0x694   : > { %v1745_v20 = vpop.permute.xlu0 %1744 }
 0x695   : > { %v1747_v12 = vpop.permute.xlu1 %1746 }
 0x696   : > { %v1754_v27 = vsel %vm609_vm2, %v1745_v20, %v1747_v12 }
 0x697   : > { %v1833_v57 = vmul.f32 %v1754_v27, %v3066_v38 }
 0x698   : > { %v1749_v29 = vpop.permute.xlu0 %1748 }
 0x699   : > { %v1753_v3 = vsel %vm609_vm2, %v1747_v12, %v1749_v29  ;;  %v1751_v17 = vpop.permute.xlu1 %1750  ;;  %v2557_v42 = vpack.c.bf16 %v1833_v57, %v1829_v24 }
 0x69a   : > { %v1834_v49 = vmul.f32 %v1753_v3, %v3072_v40  ;;  %v1752_v38 = vsel %vm609_vm2, %v1749_v29, %v1751_v17  ;;  %v1755_v5 = vsel %vm609_vm2, %v1751_v17, %v1745_v20 }
 0x69b   : > { %v1832_v31 = vmul.f32 %v1755_v5, %v3075_v41  ;;  %v1835_v19 = vmul.f32 %v1752_v38, %v3016_v9  ;;  %2558 = vmatprep.subr.bf16.mxu0 %v2557_v42 }
 0x69c   : > { %v1757_v12 = vpop.permute.xlu0 %1756  ;;  %v2575_v57 = vpack.c.bf16 %v1834_v49, %v1830_v45 }
 0x69d   : > { %v2559_v27 = vpack.c.bf16 %v1832_v31, %v1828_v48  ;;  %v1759_v40 = vpop.permute.xlu1 %1758  ;;  %v2573_v24 = vpack.c.bf16 %v1835_v19, %v1831_v22 }
 0x69e   : > { %v1766_v7 = vsel %vm622_vm3, %v1757_v12, %v1759_v40 }
 0x69f   : > { %2560 = vmatpush1.bf16.msra.mxu0 %v2559_v27  ;;  %2574 = vmatprep.subr.bf16.mxu1 %v2573_v24  ;;  %v1837_v60 = vmul.f32 %v1766_v7, %v3101_v50 }
 0x6a0   : > { %2576 = vmatpush1.bf16.msra.mxu1 %v2575_v57  ;;  %v1761_v20 = vpop.permute.xlu0 %1760 }
 0x6a1   : > { %v1763_v29 = vpop.permute.xlu1 %1762  ;;  %v1765_v3 = vsel %vm622_vm3, %v1759_v40, %v1761_v20 }
 0x6a2   : > { %v1764_v49 = vsel %vm622_vm3, %v1761_v20, %v1763_v29  ;;  %v1767_v55 = vsel %vm622_vm3, %v1763_v29, %v1757_v12  ;;  %v1838_v45 = vmul.f32 %v1765_v3, %v3104_v51 }
 0x6a3   : > { %v1836_v48 = vmul.f32 %v1767_v55, %v3107_v54  ;;  %v1839_v22 = vmul.f32 %v1764_v49, %v3110_v56  ;;  %v1844_v56 = vmul.f32 %v3698_v52, %v4004_v34  ;;  %v1846_v34 = vmul.f32 %v3706_v35, %v4002_v2 }
 0x6a4   : > { %v1769_v37 = vpop.permute.xlu0 %1768 }
 0x6a5   : > { %v1771_v41 = vpop.permute.xlu1 %1770 }
 0x6a6   : > { %v1778_v9 = vsel %vm635_vm4, %v1769_v37, %v1771_v41 }
 0x6a7   : > { %v1841_v13 = vmul.f32 %v1778_v9, %v3120_v63 }
 0x6a8   : > { %v1773_v44 = vpop.permute.xlu0 %1772 }
 0x6a9   : > { %v1777_v17 = vsel %vm635_vm4, %v1771_v41, %v1773_v44  ;;  %v1775_v42 = vpop.permute.xlu1 %1774  ;;  %v2561_v38 = vpack.c.bf16 %v1841_v13, %v1837_v60  ;;  %v1847_v41 = vmul.f32 %v3708_v33, %v4005_v21 }
 0x6aa   : > { %v1842_v5 = vmul.f32 %v1777_v17, %v3123_v6  ;;  %v1776_v50 = vsel %vm635_vm4, %v1773_v44, %v1775_v42  ;;  %v1779_v63 = vsel %vm635_vm4, %v1775_v42, %v1769_v37  ;;  %v1845_v37 = vmul.f32 %v3700_v32, %v4003_v15 }
 0x6ab   : > { %v1840_v31 = vmul.f32 %v1779_v63, %v3127_v11  ;;  %v1843_v19 = vmul.f32 %v1776_v50, %v4001_v61  ;;  %2562 = vmatprep.subr.bf16.mxu0 %v2561_v38 }
 0x6ac   : > { %v1781_v12 = vpop.permute.xlu0 %1780  ;;  %v2579_v24 = vpack.c.bf16 %v1842_v5, %v1838_v45 }
 0x6ad   : > { %v2563_v27 = vpack.c.bf16 %v1840_v31, %v1836_v48  ;;  %v1783_v6 = vpop.permute.xlu1 %1782  ;;  %v2577_v40 = vpack.c.bf16 %v1843_v19, %v1839_v22 }
 0x6ae   : > { %v1790_v57 = vsel %vm648_vm5, %v1781_v12, %v1783_v6 }
 0x6af   : > { %2564 = vmatpush1.bf16.msra.mxu0 %v2563_v27  ;;  %2578 = vmatprep.subr.bf16.mxu1 %v2577_v40  ;;  %v1848_v11 = vmul.f32 %v1790_v57, %v3142_v30 }
 0x6b0   : > { %2580 = vmatpush1.bf16.msra.mxu1 %v2579_v24  ;;  %v1785_v54 = vpop.permute.xlu0 %1784 }
 0x6b1   : > { %v1789_v51 = vsel %vm648_vm5, %v1783_v6, %v1785_v54  ;;  %v1787_v61 = vpop.permute.xlu1 %1786  ;;  %v2567_v60 = vpack.c.bf16 %v1848_v11, %v1844_v56 }
 0x6b2   : > { %v1849_v20 = vmul.f32 %v1789_v51, %v3145_v39  ;;  %v1788_v29 = vsel %vm648_vm5, %v1785_v54, %v1787_v61  ;;  %v1791_v7 = vsel %vm648_vm5, %v1787_v61, %v1781_v12  ;;  %v2426_v51 = vld [vmem:[%s3957_s4 + $0x18] sm:$0xff]  ;;  %v4014_v61 = vld [vmem:[#allocation5_spill] sm:$0xff] }
 0x6b3   : > { %v1850_v30 = vmul.f32 %v1788_v29, %v3151_v8  ;;  %v1851_v52 = vmul.f32 %v1791_v7, %v3154_v28  ;;  %v4015_v29 = vld [vmem:[#allocation7_spill] sm:$0xff] }
 0x6b4   : > { %v1793_v39 = vpop.permute.xlu0 %1792  ;;  %v2565_v9 = vpack.c.bf16 %v1849_v20, %v1845_v37 }
 0x6b5   : > { %v2583_v13 = vpack.c.bf16 %v1850_v30, %v1846_v34  ;;  %v1795_v49 = vpop.permute.xlu1 %1794  ;;  %v2581_v55 = vpack.c.bf16 %v1851_v52, %v1847_v41 }
 0x6b6   : > { %2566 = vmatprep.subr.bf16.mxu0 %v2565_v9  ;;  %v1802_v8 = vsel %vm661_vm6, %v1793_v39, %v1795_v49 }
 0x6b7   : > { %2568 = vmatpush1.bf16.msra.mxu0 %v2567_v60  ;;  %2582 = vmatprep.subr.bf16.mxu1 %v2581_v55  ;;  %v1852_v17 = vmul.f32 %v1802_v8, %v3171_v26 }
 0x6b8   : > { %2584 = vmatpush1.bf16.msra.mxu1 %v2583_v13  ;;  %v1797_v15 = vpop.permute.xlu0 %1796 }
 0x6b9   : > { %v1799_v32 = vpop.permute.xlu1 %1798  ;;  %v1801_v21 = vsel %vm661_vm6, %v1795_v49, %v1797_v15 }
 0x6ba   : > { %v1800_v33 = vsel %vm661_vm6, %v1797_v15, %v1799_v32  ;;  %v1803_v44 = vsel %vm661_vm6, %v1799_v32, %v1793_v39  ;;  %v1853_v50 = vmul.f32 %v1801_v21, %v3178_v53 }
 0x6bb   : > { %v1854_v31 = vmul.f32 %v1800_v33, %v3236_v47  ;;  %v1855_v26 = vmul.f32 %v1803_v44, %v3241_v58 }
 0x6bc   : > { %v1805_v2 = vpop.permute.xlu0 %1804 }
 0x6bd   : > { %v1807_v35 = vpop.permute.xlu1 %1806 }
 0x6be   : > { %v1814_v28 = vsel %vm674_vm7, %v1805_v2, %v1807_v35 }
 0x6bf   : > { %v1856_v42 = vmul.f32 %v1814_v28, %v3244_v46 }
 0x6c0   : > { %v1809_v3 = vpop.permute.xlu0 %1808 }
 0x6c1   : > { %v1813_v38 = vsel %vm674_vm7, %v1807_v35, %v1809_v3  ;;  %v1811_v5 = vpop.permute.xlu1 %1810  ;;  %v2571_v27 = vpack.c.bf16 %v1856_v42, %v1852_v17  ;;  %v4016_v42 = vld [vmem:[#allocation9_spill] sm:$0xff] }
 0x6c2   : > { %v1857_v63 = vmul.f32 %v1813_v38, %v3256_v0  ;;  %v1812_v48 = vsel %vm674_vm7, %v1809_v3, %v1811_v5  ;;  %v1815_v22 = vsel %vm674_vm7, %v1811_v5, %v1805_v2  ;;  %v4017_v5 = vld [vmem:[#allocation10_spill] sm:$0xff] }
 0x6c3   : > { %v1858_v46 = vmul.f32 %v1812_v48, %v3260_v36  ;;  %v1859_v19 = vmul.f32 %v1815_v22, %v3251_v1 }
 0x6c4   : > { %v1817_v45 = vpop.permute.xlu0 %1816  ;;  %v2569_v12 = vpack.c.bf16 %v1857_v63, %v1853_v50 }
 0x6c5   : > { %v2587_v53 = vpack.c.bf16 %v1858_v46, %v1854_v31  ;;  %v1819_v6 = vpop.permute.xlu1 %1818  ;;  %v2585_v0 = vpack.c.bf16 %v1859_v19, %v1855_v26 }
 0x6c6   : > { %2570 = vmatprep.subr.bf16.mxu0 %v2569_v12  ;;  %v1826_v40 = vsel %vm687_vm8, %v1817_v45, %v1819_v6 }
 0x6c7   : > { %2572 = vmatpush1.bf16.msra.mxu0 %v2571_v27  ;;  %2586 = vmatprep.subr.bf16.mxu1 %v2585_v0  ;;  %v1860_v54 = vmul.f32 %v1826_v40, %v3301_v25 }
 0x6c8   : > { %2588 = vmatpush1.bf16.msra.mxu1 %v2587_v53  ;;  %v1821_v47 = vpop.permute.xlu0 %1820 }
 0x6c9   : > { %v1825_v58 = vsel %vm687_vm8, %v1819_v6, %v1821_v47  ;;  %v1823_v36 = vpop.permute.xlu1 %1822 }
 0x6ca   : > { %v1861_v1 = vmul.f32 %v1825_v58, %v3298_v23  ;;  %v1824_v24 = vsel %vm687_vm8, %v1821_v47, %v1823_v36  ;;  %v1827_v57 = vsel %vm687_vm8, %v1823_v36, %v1817_v45 }
 0x6cb   : > { %v1862_v56 = vmul.f32 %v1824_v24, %v3295_v18  ;;  %v1863_v11 = vmul.f32 %v1827_v57, %v3292_v14  ;;  %v4012_v18 = vld [vmem:[#allocation4_spill] sm:$0xff]  ;;  %v4013_v14 = vld [vmem:[#allocation6_spill] sm:$0xff] }
 0x6cc   : > { %1888 = vmatprep.subr.mxu0 %v1861_v1 }
 0x6cd   : > { %1889 = vmatpush1.msra.mxu0 %v1860_v54  ;;  %1959 = vmatprep.subr.mxu1 %v1863_v11 }
 0x6ce   : > { %2428 = vmatmul.mubr.msk.f32.vlgmr.msra.gmra.mrb[10].mxu0 %vm922_vm9, %v2426_v51  ;;  %1960 = vmatpush1.msra.mxu1 %v1862_v56 }
 0x6cf   : > { %2429 = vmatmul.mubr.msk.f32.vlgmr.msra.gmra.mrb[10].mxu1 %vm922_vm9, %v2426_v51  ;;  %2131 = vmatprep.mubr.f32.mxu0 %v4000_v16 }
 0x6d0   : > { %2208 = vmatprep.mubr.f32.mxu1 %v4000_v16 }
 0x6d9   : > { %v351_v62 = vpop.permute.xlu0 %350 }
 0x6da   : > { %v432_v23 = vadd.f32 %v4012_v18, %v351_v62  ;;  %v434_v25 = vadd.f32 %v4013_v14, %v351_v62  ;;  %v509_v20 = vadd.f32 %v4014_v61, %v351_v62  ;;  %v511_v7 = vadd.f32 %v4015_v29, %v351_v62  ;;  %v1867_v63 = vpop.permute.xlu1 %1866  ;;  %v4018_v61 = vld [vmem:[#allocation16_spill] sm:$0xff]  ;;  %v4019_v29 = vld [vmem:[#allocation13_spill] sm:$0xff] }
 0x6dc   : > { %v2396_v37 = vmul.f32 -1.442695, %v432_v23  ;;  %v2397_v34 = vmul.f32 -1.442695, %v434_v25  ;;  %v2398_v30 = vmul.f32 -1.442695, %v509_v20 }
 0x6dd   : > { %v2399_v52 = vmul.f32 -1.442695, %v511_v7 }
 0x6de   : > { %2705 = vpow2.f32 %v2396_v37 }
 0x6df   : > { %2707 = vpow2.f32 %v2397_v34 }
 0x6e0   : > { %2709 = vpow2.f32 %v2398_v30 }
 0x6e1   : > { %2711 = vpow2.f32 %v2399_v52 }
 0x6e8   : > { %v2706_v41 = vpop.eup %2705 }
 0x6e9   : > { %v2708_v39 = vpop.eup %2707  ;;  %v543_v9 = vadd.f32 1.0, %v2706_v41  ;;  %v2046_v41 = vld [vmem:[%s3959_s6] sm:$0xff] }
 0x6ea   : > { %v2710_v60 = vpop.eup %2709  ;;  %v544_v13 = vadd.f32 1.0, %v2708_v39 }
 0x6eb   : > { %v2712_v49 = vpop.eup %2711  ;;  %v545_v55 = vadd.f32 1.0, %v2710_v60  ;;  %2713 = vrcp.f32 %v543_v9 }
 0x6ec   : > { %v546_v15 = vadd.f32 1.0, %v2712_v49  ;;  %2715 = vrcp.f32 %v544_v13 }
 0x6ed   : > { %2717 = vrcp.f32 %v545_v55 }
 0x6ee   : > { %2719 = vrcp.f32 %v546_v15 }
 0x6f5   : > { %v2714_v32 = vpop.eup %2713 }
 0x6f6   : > { %v2716_v2 = vpop.eup %2715  ;;  %v567_v35 = vmul.f32 %v2714_v32, %v432_v23 }
 0x6f7   : > { %v2718_v8 = vpop.eup %2717  ;;  %v568_v28 = vmul.f32 %v2716_v2, %v434_v25  ;;  %v2058_v2 = vpop.permute.xlu1 %2057 }
 0x6f8   : > { %v2720_v21 = vpop.eup %2719  ;;  %v569_v33 = vmul.f32 %v2718_v8, %v509_v20  ;;  %v2591_v44 = vpack.c.bf16 %v4006_v10, %v567_v35 }
 0x6f9   : > { %v2589_v3 = vpack.c.bf16 %v4007_v4, %v568_v28  ;;  %v570_v17 = vmul.f32 %v2720_v21, %v511_v7 }
 0x6fa   : > { %v2599_v38 = vpack.c.bf16 %v4016_v42, %v569_v33 }
 0x6fb   : > { %2590 = vmatprep.subr.bf16.mxu0 %v2589_v3  ;;  %v2597_v50 = vpack.c.bf16 %v4017_v5, %v570_v17 }
 0x6fc   : > { %2592 = vmatpush1.bf16.msra.mxu0 %v2591_v44 }
 0x6fd   : > { %2598 = vmatprep.subr.bf16.mxu1 %v2597_v50 }
 0x6fe   : > { %2600 = vmatpush1.bf16.msra.mxu1 %v2599_v38 }
 0x7a1   : > { %v1938_v48 = vpop.f32.mrb[10].mxu0 }
 0x7a2   : > { %v1939_v22 = vadd.f32 %v1938_v48, %v1867_v63  ;;  %v1940_v31 = vpop.f32.mrb[11].mxu0  ;;  %v2009_v26 = vpop.f32.mrb[10].mxu1 }
 0x7a3   : > { %v1941_v46 = vadd.f32 %v1940_v31, %v1867_v63  ;;  %v2010_v19 = vadd.f32 %v2009_v26, %v1867_v63  ;;  %v2011_v45 = vpop.f32.mrb[11].mxu1 }
 0x7a4   : > { %v2430_v10 = vmul.f32 -1.442695, %v1939_v22  ;;  %v2012_v12 = vadd.f32 %v2011_v45, %v1867_v63 }
 0x7a5   : > { %v2431_v4 = vmul.f32 -1.442695, %v1941_v46  ;;  %v2432_v27 = vmul.f32 -1.442695, %v2010_v19 }
 0x7a6   : > { %2721 = vpow2.f32 %v2430_v10  ;;  %v2433_v53 = vmul.f32 -1.442695, %v2012_v12 }
 0x7a7   : > { %2723 = vpow2.f32 %v2431_v4 }
 0x7a8   : > { %2725 = vpow2.f32 %v2432_v27 }
 0x7a9   : > { %2727 = vpow2.f32 %v2433_v53 }
 0x7b0   : > { %v2722_v6 = vpop.eup %2721 }
 0x7b1   : > { %v2724_v0 = vpop.eup %2723  ;;  %v2026_v40 = vadd.f32 1.0, %v2722_v6 }
 0x7b2   : > { %v2726_v47 = vpop.eup %2725  ;;  %v2027_v58 = vadd.f32 1.0, %v2724_v0 }
 0x7b3   : > { %v2728_v36 = vpop.eup %2727  ;;  %2729 = vrcp.f32 %v2026_v40  ;;  %v2028_v1 = vadd.f32 1.0, %v2726_v47 }
 0x7b4   : > { %2731 = vrcp.f32 %v2027_v58  ;;  %v2029_v24 = vadd.f32 1.0, %v2728_v36 }
 0x7b5   : > { %2733 = vrcp.f32 %v2028_v1 }
 0x7b6   : > { %2735 = vrcp.f32 %v2029_v24 }
 0x7bd   : > { %v2730_v57 = vpop.eup %2729 }
 0x7be   : > { %v2732_v54 = vpop.eup %2731  ;;  %v2038_v56 = vmul.f32 %v2730_v57, %v1939_v22 }
 0x7bf   : > { %v2734_v11 = vpop.eup %2733  ;;  %v2039_v51 = vmul.f32 %v2732_v54, %v1941_v46 }
 0x7c0   : > { %v2736_v62 = vpop.eup %2735  ;;  %v2042_v18 = vadd.f32 %v2038_v56, %v3509_v43  ;;  %v2040_v23 = vmul.f32 %v2734_v11, %v2010_v19 }
 0x7c1   : > { %v2043_v14 = vadd.f32 %v2039_v51, %v3512_v59  ;;  %v2041_v25 = vmul.f32 %v2736_v62, %v2012_v12 }
 0x7c2   : > { %v2044_v20 = vadd.f32 %v2040_v23, %v4018_v61  ;;  %v2595_v34 = vpack.c.bf16 %v2042_v18, %v3509_v43  ;;  %v2047_v43 = vld [vmem:[%s3959_s6 + $0x8] sm:$0xff] }
 0x7c3   : > { %v2045_v7 = vadd.f32 %v2041_v25, %v4019_v29  ;;  %v2593_v37 = vpack.c.bf16 %v2043_v14, %v3512_v59  ;;  %v2053_v59 = vpop.permute.xlu0 %2052 }
 0x7c4   : > { %v2603_v52 = vpack.c.bf16 %v2044_v20, %v4018_v61 }
 0x7c5   : > { %2594 = vmatprep.subr.bf16.mxu0 %v2593_v37  ;;  %v2601_v30 = vpack.c.bf16 %v2045_v7, %v4019_v29 }
 0x7c6   : > { %2596 = vmatpush1.bf16.msra.mxu0 %v2595_v34 }
 0x7c7   : > { %2602 = vmatprep.subr.bf16.mxu1 %v2601_v30 }
 0x7c8   : > { %2604 = vmatpush1.bf16.msra.mxu1 %v2603_v52 }
 0x7c9   : > { %2434 = vmatmul.mubr.msk.f32.vlgmr.msra.gmra.mrb[12].mxu0 %vm2060_vm10, %v2046_v41 }
 0x7ca   : > { %2137 = vmatprep.mubr.f32.mxu0 %v4000_v16 }
 0x7cb   : > { %2436 = vmatmul.mubr.msk.f32.vlgmr.msra.gmra.mrb[12].mxu1 %vm2060_vm10, %v2046_v41 }
 0x7cc   : > { %2214 = vmatprep.mubr.f32.mxu1 %v4000_v16 }
 0x7cd   : > { %2435 = vmatmul.mubr.msk.f32.gmra.mrb[14].mxu0 %vm2060_vm10, %v2047_v43 }
 0x7cf   : > { %2437 = vmatmul.mubr.msk.f32.gmra.mrb[14].mxu1 %vm2060_vm10, %v2047_v43 }
 0x89c   : > { %v2133_v39 = vpop.f32.mrb[12].mxu0 }
 0x89d   : > { %v2134_v9 = vadd.f32 %v2133_v39, %v2053_v59  ;;  %v2135_v60 = vpop.f32.mrb[13].mxu0 }
 0x89e   : > { %v2136_v13 = vadd.f32 %v2135_v60, %v2053_v59  ;;  %v2210_v49 = vpop.f32.mrb[12].mxu1 }
 0x89f   : > { %v2438_v55 = vmul.f32 -1.442695, %v2134_v9  ;;  %v2211_v15 = vadd.f32 %v2210_v49, %v2053_v59  ;;  %v2212_v32 = vpop.f32.mrb[13].mxu1 }
 0x8a0   : > { %v2439_v35 = vmul.f32 -1.442695, %v2136_v13  ;;  %v2213_v8 = vadd.f32 %v2212_v32, %v2053_v59  ;;  %v2139_v28 = vpop.f32.mrb[14].mxu0 }
 0x8a1   : > { %2737 = vpow2.f32 %v2438_v55  ;;  %v2440_v21 = vmul.f32 -1.442695, %v2211_v15  ;;  %v2140_v33 = vadd.f32 %v2139_v28, %v2058_v2  ;;  %v2141_v44 = vpop.f32.mrb[15].mxu0 }
 0x8a2   : > { %2739 = vpow2.f32 %v2439_v35  ;;  %v2441_v16 = vmul.f32 -1.442695, %v2213_v8  ;;  %v2142_v3 = vadd.f32 %v2141_v44, %v2058_v2  ;;  %v2216_v17 = vpop.f32.mrb[14].mxu1 }
 0x8a3   : > { %2741 = vpow2.f32 %v2440_v21  ;;  %v2442_v42 = vmul.f32 -1.442695, %v2140_v33  ;;  %v2217_v38 = vadd.f32 %v2216_v17, %v2058_v2  ;;  %v2218_v5 = vpop.f32.mrb[15].mxu1 }
 0x8a4   : > { %2743 = vpow2.f32 %v2441_v16  ;;  %v2443_v50 = vmul.f32 -1.442695, %v2142_v3  ;;  %v2219_v63 = vadd.f32 %v2218_v5, %v2058_v2 }
 0x8a5   : > { %2745 = vpow2.f32 %v2442_v42  ;;  %v2444_v48 = vmul.f32 -1.442695, %v2217_v38 }
 0x8a6   : > { %2747 = vpow2.f32 %v2443_v50  ;;  %v2445_v22 = vmul.f32 -1.442695, %v2219_v63 }
 0x8a7   : > { %2749 = vpow2.f32 %v2444_v48 }
 0x8a8   : > { %2751 = vpow2.f32 %v2445_v22 }
 0x8ab   : > { %v2738_v31 = vpop.eup %2737 }
 0x8ac   : > { %v2740_v26 = vpop.eup %2739  ;;  %v2245_v46 = vadd.f32 1.0, %v2738_v31 }
 0x8ad   : > { %v2742_v19 = vpop.eup %2741  ;;  %v2246_v45 = vadd.f32 1.0, %v2740_v26 }
 0x8ae   : > { %v2744_v10 = vpop.eup %2743  ;;  %2753 = vrcp.f32 %v2245_v46  ;;  %v2247_v12 = vadd.f32 1.0, %v2742_v19 }
 0x8af   : > { %v2746_v4 = vpop.eup %2745  ;;  %2755 = vrcp.f32 %v2246_v45  ;;  %v2248_v27 = vadd.f32 1.0, %v2744_v10 }
 0x8b0   : > { %v2748_v53 = vpop.eup %2747  ;;  %2757 = vrcp.f32 %v2247_v12  ;;  %v2249_v6 = vadd.f32 1.0, %v2746_v4 }
 0x8b1   : > { %v2750_v0 = vpop.eup %2749  ;;  %2759 = vrcp.f32 %v2248_v27  ;;  %v2250_v40 = vadd.f32 1.0, %v2748_v53 }
 0x8b2   : > { %v2752_v47 = vpop.eup %2751  ;;  %2761 = vrcp.f32 %v2249_v6  ;;  %v2251_v58 = vadd.f32 1.0, %v2750_v0 }
 0x8b3   : > { %2763 = vrcp.f32 %v2250_v40  ;;  %v2252_v36 = vadd.f32 1.0, %v2752_v47 }
 0x8b4   : > { %2765 = vrcp.f32 %v2251_v58 }
 0x8b5   : > { %2767 = vrcp.f32 %v2252_v36 }
 0x8b8   : > { %v2754_v1 = vpop.eup %2753 }
 0x8b9   : > { %v2756_v24 = vpop.eup %2755  ;;  %v2269_v57 = vmul.f32 %v2754_v1, %v2134_v9 }
 0x8ba   : > { %v2758_v54 = vpop.eup %2757  ;;  %v2270_v56 = vmul.f32 %v2756_v24, %v2136_v13 }
 0x8bb   : > { %v2760_v11 = vpop.eup %2759  ;;  %2277 = vst [vmem:[%s3918_s24] sm:$0xff] %v2269_v57  ;;  %v2271_v51 = vmul.f32 %v2758_v54, %v2211_v15 }
 0x8bc   : > { %v2762_v62 = vpop.eup %2761  ;;  %2278 = vst [vmem:[%s3918_s24 + $0x8] sm:$0xff] %v2270_v56  ;;  %v2272_v18 = vmul.f32 %v2760_v11, %v2213_v8  ;;  %2291 = sbr.rel (!%p2878_p5) target bundleno = 2251 (0x8cb), region = 79 }
 0x8bd   : > { %v2764_v23 = vpop.eup %2763  ;;  %2279 = vst [vmem:[%s3918_s24 + $0x10] sm:$0xff] %v2271_v51  ;;  %v2273_v14 = vmul.f32 %v2762_v62, %v2140_v33 }
 0x8be   : > { %v2766_v25 = vpop.eup %2765  ;;  %2280 = vst [vmem:[%s3918_s24 + $0x18] sm:$0xff] %v2272_v18  ;;  %v2274_v61 = vmul.f32 %v2764_v23, %v2142_v3 }
 0x8bf   : > { %v2768_v20 = vpop.eup %2767  ;;  %2281 = vst [vmem:[%s3918_s24 + $0x20] sm:$0xff] %v2273_v14  ;;  %v2275_v29 = vmul.f32 %v2766_v25, %v2217_v38 }
 0x8c0   : > { %2282 = vst [vmem:[%s3918_s24 + $0x28] sm:$0xff] %v2274_v61  ;;  %v2276_v7 = vmul.f32 %v2768_v20, %v2219_v63 }
 0x8c1   : > { %2283 = vst [vmem:[%s3918_s24 + $0x30] sm:$0xff] %v2275_v29 }
 0x8c2   : > { %2284 = vst [vmem:[%s3918_s24 + $0x38] sm:$0xff] %v2276_v7  ;;  %v2307_v37 = vld [vmem:[%s3918_s24] sm:$0xff] (%p2878_p5) }
 0x8c3   : > { %v2309_v34 = vld [vmem:[%s3918_s24 + $0x8] sm:$0xff]  ;;  %2308 = vst [vmem:[%s2294_s16] sm:$0xff] %v2307_v37 }
 0x8c4   : > { %v2311_v30 = vld [vmem:[%s3918_s24 + $0x10] sm:$0xff]  ;;  %2310 = vst [vmem:[%s2294_s16 + $0x8] sm:$0xff] %v2309_v34 }
 0x8c5   : > { %v2313_v52 = vld [vmem:[%s3918_s24 + $0x18] sm:$0xff]  ;;  %2312 = vst [vmem:[%s2294_s16 + $0x10] sm:$0xff] %v2311_v30 }
 0x8c6   : > { %v2315_v41 = vld [vmem:[%s3918_s24 + $0x20] sm:$0xff]  ;;  %2314 = vst [vmem:[%s2294_s16 + $0x18] sm:$0xff] %v2313_v52 }
 0x8c7   : > { %v2317_v43 = vld [vmem:[%s3918_s24 + $0x28] sm:$0xff]  ;;  %2316 = vst [vmem:[%s2294_s16 + $0x40] sm:$0xff] %v2315_v41 }
 0x8c8   : > { %2318 = vst [vmem:[%s2294_s16 + $0x48] sm:$0xff] %v2317_v43  ;;  %v2319_v59 = vld [vmem:[%s3918_s24 + $0x30] sm:$0xff] }
 0x8c9   : > { %v2321_v39 = vld [vmem:[%s3918_s24 + $0x38] sm:$0xff]  ;;  %2320 = vst [vmem:[%s2294_s16 + $0x50] sm:$0xff] %v2319_v59 }
 0x8ca   : > { %2322 = vst [vmem:[%s2294_s16 + $0x58] sm:$0xff] %v2321_v39 }
 0x8cb PF: > { %p15_p10 = scmp.ge.s32.totalorder %s2865_s9, 4   ;;  %s4020_s27 = smov %s2787_s28 }
 0x8cc   : > { %s4021_s28 = smov %s2876_s12  ;;  %s4022_s29 = smov %s2865_s9 }
 0x8cd   :  { %17 = sbr.rel (!%p15_p10) target bundleno = 2 (0x2), region = 139 }

</bundles_post_ra>
